<compile_context>
chip_gen: v7x
topology: tpu7x:2x2x1
jax: 0.10.0
libtpu: 0.0.40
codegen_flags: <defaults>
</compile_context>

<pallas_src>
import functools

import jax
import jax.numpy as jnp
from jax.experimental import pallas as pl
from jax.experimental.pallas import tpu as pltpu


# ----------------------------- Pallas kernel --------------------------------
def user_encoder_kernel(
    # scalar prefetch (SMEM)
    idx_ref,      # [B, 3] int32: (user_id, age, gender) per row
    # inputs
    am_ref,       # [B, A+M]      raw concat(articles, moments)          (VMEM)
    bn_ref,       # [16, A+M]     row0 = gamma, row1 = beta (combined BN) (VMEM)
    wts_ref,      # [E+A+M, OUTP] rows 0:E = W_out[:E]; rows E: = folded W_am (VMEM)
    ag_hbm,       # [16, OUTP]    pre-projected age/gender rows (+ all biases) (HBM/ANY)
    uemb_hbm,     # [V, E]        user-embedding table                    (HBM/ANY)
    # output
    o_ref,        # [B, OUTP]
    # scratch
    uemb_buf,     # VMEM (B, E)     gathered user-embedding rows
    ag_scr,       # VMEM (B, OUTP)  gathered age/gender(+bias) rows
    sem,          # DMA semaphores (2, B)
    *, B, AM, E,
):
    eps = jnp.float32(1e-5)

    # -- 1. Kick off all row-gather DMAs up front; they overlap the BN/matmul. --
    #    (All SMEM scalar reads happen here, before any .wait().)
    copies = []
    for b in range(B):
        uid = idx_ref[b, 0]
        cp = pltpu.make_async_copy(
            uemb_hbm.at[pl.ds(uid, 1)], uemb_buf.at[pl.ds(b, 1)], sem.at[0, b])
        cp.start()
        copies.append(cp)
        code = idx_ref[b, 1] * 2 + idx_ref[b, 2]          # age * 2 + gender
        cp = pltpu.make_async_copy(
            ag_hbm.at[pl.ds(code, 1)], ag_scr.at[pl.ds(b, 1)], sem.at[1, b])
        cp.start()
        copies.append(cp)

    # -- 2. BatchNorm1d over the combined [articles | moments] slab ------------
    #    Training-mode biased batch stats; BN is per-column so merging the two
    #    BN layers is exact.  One-pass variance, clamped >= 0 (NaN guard).
    x = am_ref[...]
    mu = jnp.mean(x, axis=0, keepdims=True)
    var = jnp.maximum(jnp.mean(x * x, axis=0, keepdims=True) - mu * mu, 0.0)
    bn = bn_ref[...]
    gamma, beta = bn[0:1, :], bn[1:2, :]                  # [1, A+M] broadcast rows
    x_n = (x - mu) * jax.lax.rsqrt(var + eps) * gamma + beta

    # -- 3. Folded (feature|moments Linear) o (out Linear): one MXU push -------
    acc = jnp.dot(x_n, wts_ref[E:E + AM, :], preferred_element_type=jnp.float32)

    # -- 4. Wait for the gathered rows, finish with the user-embedding matmul --
    for cp in copies:
        cp.wait()
    acc += jnp.dot(uemb_buf[...], wts_ref[0:E, :], preferred_element_type=jnp.float32)

    # ag_scr rows already hold the age/gender contributions + every bias term.
    o_ref[...] = acc + ag_scr[...]


# ------------------------- one-time parameter packing ------------------------
def pack_user_encoder_params(params):
    """Run once when parameters change; keeps the per-call path free of packing."""
    f32 = jnp.float32
    A = params["w_feature"].shape[0]
    M = params["w_moments"].shape[0]
    E = params["w_feature"].shape[1]
    two_h = params["w_out"].shape[1]
    outp = ((two_h + 127) // 128) * 128                  # lane-pad output width

    W = params["w_out"].astype(f32)                      # [5E, 2H]
    Wu, Wa, Wg = W[0:E], W[E:2 * E], W[2 * E:3 * E]
    Wf_out, Wm_out = W[3 * E:4 * E], W[4 * E:5 * E]

    # Fold the feature / moments_lda Linears into the output projection.
    w_am = jnp.concatenate(
        [params["w_feature"].astype(f32) @ Wf_out,
         params["w_moments"].astype(f32) @ Wm_out], axis=0)          # [A+M, 2H]
    wts = jnp.zeros((E + A + M, outp), f32)
    wts = wts.at[:E, :two_h].set(Wu)
    wts = wts.at[E:, :two_h].set(w_am)

    # Pre-project the tiny age/gender tables through their W_out slabs and fold
    # every bias term in -> 12-row lookup table indexed by age*2 + gender.
    b_total = (params["b_feature"].reshape(1, -1).astype(f32) @ Wf_out
               + params["b_moments"].reshape(1, -1).astype(f32) @ Wm_out
               + params["b_out"].reshape(1, -1).astype(f32))         # [1, 2H]
    age_out = params["age_emb"].astype(f32) @ Wa                     # [6, 2H]
    gen_out = params["gender_emb"].astype(f32) @ Wg                  # [2, 2H]
    ag = (age_out[:, None, :] + gen_out[None, :, :]).reshape(-1, two_h) + b_total
    ag_pad = jnp.zeros((16, outp), f32).at[:ag.shape[0], :two_h].set(ag)

    # Combined-slab BatchNorm affine params: row 0 gamma, row 1 beta.
    bn = jnp.zeros((16, A + M), f32)
    bn = bn.at[0, :A].set(params["bn_a_gamma"].reshape(-1).astype(f32))
    bn = bn.at[0, A:].set(params["bn_m_gamma"].reshape(-1).astype(f32))
    bn = bn.at[1, :A].set(params["bn_a_beta"].reshape(-1).astype(f32))
    bn = bn.at[1, A:].set(params["bn_m_beta"].reshape(-1).astype(f32))

    packed = {"wts": wts, "ag": ag_pad, "bn": bn,
              "user_emb": params["user_emb"].astype(f32)}
    meta = {"E": E, "outp": outp, "two_h": two_h}
    return packed, meta


# ------------------------------- forward -------------------------------------
@functools.partial(jax.jit, static_argnames=("E", "outp"))
def _user_encoder_fwd(articles, moments, uid, age, gender,
                      bn, wts, ag, user_emb, *, E, outp):
    f32 = jnp.float32
    B = articles.shape[0]
    am = jnp.concatenate([articles, moments], axis=1).astype(f32)    # [B, A+M]
    AM = am.shape[1]
    idx = jnp.stack([uid.astype(jnp.int32), age.astype(jnp.int32),
                     gender.astype(jnp.int32)], axis=1)              # [B, 3]

    kernel = functools.partial(user_encoder_kernel, B=B, AM=AM, E=E)
    grid_spec = pltpu.PrefetchScalarGridSpec(
        num_scalar_prefetch=1,
        grid=(1,),
        in_specs=[
            pl.BlockSpec((B, AM), lambda i, idx: (0, 0)),            # am slab
            pl.BlockSpec(bn.shape, lambda i, idx: (0, 0)),           # BN gamma/beta
            pl.BlockSpec(wts.shape, lambda i, idx: (0, 0)),          # folded weights
            pl.BlockSpec(memory_space=pl.ANY),                       # ag table (HBM)
            pl.BlockSpec(memory_space=pl.ANY),                       # user_emb (HBM)
        ],
        out_specs=pl.BlockSpec((B, outp), lambda i, idx: (0, 0)),
        scratch_shapes=[
            pltpu.VMEM((B, E), f32),
            pltpu.VMEM((B, outp), f32),
            pltpu.SemaphoreType.DMA((2, B)),
        ],
    )
    return pl.pallas_call(
        kernel,
        out_shape=jax.ShapeDtypeStruct((B, outp), f32),
        grid_spec=grid_spec,
        compiler_params=pltpu.CompilerParams(
            dimension_semantics=("arbitrary",)),
    )(idx, am, bn, wts, ag, user_emb)


def user_encoder_forward(packed, meta, user):
    """Returns the lane-padded [B, outp] output; columns [:2*hidden] hold the
    module's result (padding lanes are exactly zero, so downstream consumers can
    use the padded form directly and skip the slice)."""
    return _user_encoder_fwd(
        user["articles"], user["moments"], user["id"], user["age"], user["gender"],
        packed["bn"], packed["wts"], packed["ag"], packed["user_emb"],
        E=meta["E"], outp=meta["outp"])


# --------------------------- pure-JAX reference -------------------------------
def user_encoder_reference(user, params):
    eps = 1e-5
    art = user["articles"].astype(jnp.float32)
    mom = user["moments"].astype(jnp.float32)
    mu_a, var_a = jnp.mean(art, 0), jnp.var(art, 0)
    art_n = (art - mu_a) / jnp.sqrt(var_a + eps) * params["bn_a_gamma"] + params["bn_a_beta"]
    mu_m, var_m = jnp.mean(mom, 0), jnp.var(mom, 0)
    mom_n = (mom - mu_m) / jnp.sqrt(var_m + eps) * params["bn_m_gamma"] + params["bn_m_beta"]
    art_e = art_n @ params["w_feature"] + params["b_feature"]
    mom_e = mom_n @ params["w_moments"] + params["b_moments"]
    uemb = params["user_emb"][user["id"]]
    age_e = params["age_emb"][user["age"]]
    gen_e = params["gender_emb"][user["gender"]]
    cat = jnp.concatenate([uemb, age_e, gen_e, art_e, mom_e], axis=1)
    return cat @ params["w_out"] + params["b_out"]


# ------------------------------- main -----------------------------------------
if __name__ == "__main__":
    # Small config consistent with the module:
    #   user_article_len = 16, moments_lda_len = 16, emb_size = 32, hidden_size = 32
    B, A, M, E, H = 8, 16, 16, 32, 32
    USER_VOCAB, AGE_VOCAB, GENDER_VOCAB = 190662, 6, 2

    key = jax.random.PRNGKey(0)
    ks = jax.random.split(key, 12)

    def xavier(k, shape):
        fan_in, fan_out = shape[0], shape[1]
        limit = (6.0 / (fan_in + fan_out)) ** 0.5
        return jax.random.uniform(k, shape, jnp.float32, -limit, limit)

    params = {
        # embeddings (xavier-uniform, matching init_emb)
        "user_emb": xavier(ks[0], (USER_VOCAB, E)),
        "age_emb": xavier(ks[1], (AGE_VOCAB, E)),
        "gender_emb": xavier(ks[2], (GENDER_VOCAB, E)),
        # Linear layers, stored as [in, out] (== torch weight.T)
        "w_feature": xavier(ks[3], (A, E)),
        "b_feature": jax.random.normal(ks[4], (1, E), jnp.float32) * 0.01,
        "w_moments": xavier(ks[5], (M, E)),
        "b_moments": jax.random.normal(ks[6], (1, E), jnp.float32) * 0.01,
        "w_out": xavier(ks[7], (5 * E, 2 * H)),
        "b_out": jax.random.normal(ks[8], (1, 2 * H), jnp.float32) * 0.01,
        # BatchNorm affine params (kept non-trivial to exercise the math)
        "bn_a_gamma": 1.0 + 0.1 * jax.random.normal(ks[9], (1, A), jnp.float32),
        "bn_a_beta": 0.1 * jax.random.normal(ks[10], (1, A), jnp.float32),
        "bn_m_gamma": jnp.ones((1, M), jnp.float32),
        "bn_m_beta": jnp.zeros((1, M), jnp.float32),
    }

    ik = jax.random.split(jax.random.PRNGKey(1), 5)
    user = {
        "articles": jax.random.normal(ik[0], (B, A), jnp.float32),
        "moments": jax.random.normal(ik[1], (B, M), jnp.float32),
        "id": jax.random.randint(ik[2], (B,), 0, USER_VOCAB),
        "age": jax.random.randint(ik[3], (B,), 0, AGE_VOCAB),
        "gender": jax.random.randint(ik[4], (B,), 0, GENDER_VOCAB),
    }

    # Pack once (hoisted out of the per-call path), then run the kernel.
    packed, meta = pack_user_encoder_params(params)
    out_pad = user_encoder_forward(packed, meta, user)
    out_pad = jax.block_until_ready(out_pad)

    two_h = meta["two_h"]
    out = out_pad[:, :two_h]          # slice only for the correctness check
    ref = user_encoder_reference(user, params)
    assert out_pad.shape == (B, meta["outp"])
    assert out.shape == (B, two_h)
    assert jnp.allclose(out, ref, rtol=1e-4, atol=1e-4), "mismatch vs reference"
    assert jnp.all(out_pad[:, two_h:] == 0.0), "padding lanes must stay zero"

    print("KERNEL_OK")
</pallas_src>

<mosaic_0001>
module attributes {stable_mosaic.version = 11 : i64} {
  func.func @user_encoder_kernel(%arg0: i32, %arg1: memref<8x3xi32, #tpu.memory_space<smem>>, %arg2: memref<8x32xf32, #tpu.memory_space<vmem>>, %arg3: memref<16x32xf32, #tpu.memory_space<vmem>>, %arg4: memref<64x128xf32, #tpu.memory_space<vmem>>, %arg5: memref<16x128xf32, #tpu.memory_space<any>>, %arg6: memref<190662x32xf32, #tpu.memory_space<any>>, %arg7: memref<8x128xf32, #tpu.memory_space<vmem>>, %arg8: memref<8x32xf32, #tpu.memory_space<vmem>>, %arg9: memref<8x128xf32, #tpu.memory_space<vmem>>, %arg10: memref<2x8x!tpu.dma_semaphore, #tpu.memory_space<semaphore_mem>>) attributes {dimension_semantics = [#tpu.dimension_semantics<arbitrary>], iteration_bounds = array<i64: 1>, scalar_prefetch = 1 : i64, scratch_operands = 3 : i64, tpu.core_type = #tpu.core_type<tc>, window_params = [{pipeline_mode = #tpu.pipeline_mode<synchronous>, transform_indices = @transform_0, window_bounds = array<i64: 8, 32>}, {pipeline_mode = #tpu.pipeline_mode<synchronous>, transform_indices = @transform_1, window_bounds = array<i64: 16, 32>}, {pipeline_mode = #tpu.pipeline_mode<synchronous>, transform_indices = @transform_2, window_bounds = array<i64: 64, 128>}, {}, {}, {pipeline_mode = #tpu.pipeline_mode<synchronous>, transform_indices = @transform_5, window_bounds = array<i64: 8, 128>}]} {
    %c0 = arith.constant 0 : index
    %c0_0 = arith.constant 0 : index
    %0 = memref.load %arg1[%c0, %c0_0] : memref<8x3xi32, #tpu.memory_space<smem>>
    %c0_i32 = arith.constant 0 : i32
    %c0_i32_1 = arith.constant 0 : i32
    %c0_i32_2 = arith.constant 0 : i32
    %1 = tpu.memref_slice %arg6[%0, %c0_i32_2] : memref<190662x32xf32, #tpu.memory_space<any>> -> memref<1x32xf32, #tpu.memory_space<any>>
    %c0_i32_3 = arith.constant 0 : i32
    %c0_i32_4 = arith.constant 0 : i32
    %2 = tpu.memref_slice %arg8[%c0_i32_3, %c0_i32_4] : memref<8x32xf32, #tpu.memory_space<vmem>> -> memref<1x32xf32, #tpu.memory_space<vmem>>
    %3 = tpu.memref_slice %arg10[%c0_i32, %c0_i32_1] : memref<2x8x!tpu.dma_semaphore, #tpu.memory_space<semaphore_mem>> -> memref<1x1x!tpu.dma_semaphore, #tpu.memory_space<semaphore_mem>>
    %4 = tpu.memref_squeeze %3 : memref<1x1x!tpu.dma_semaphore, #tpu.memory_space<semaphore_mem>> -> memref<!tpu.dma_semaphore, #tpu.memory_space<semaphore_mem>>
    tpu.enqueue_dma source(%1 : memref<1x32xf32, #tpu.memory_space<any>>) target(%2 : memref<1x32xf32, #tpu.memory_space<vmem>>) target_semaphore(%4 : memref<!tpu.dma_semaphore, #tpu.memory_space<semaphore_mem>>)
    %c0_5 = arith.constant 0 : index
    %c1 = arith.constant 1 : index
    %5 = memref.load %arg1[%c0_5, %c1] : memref<8x3xi32, #tpu.memory_space<smem>>
    %c2_i32 = arith.constant 2 : i32
    %6 = arith.muli %5, %c2_i32 : i32
    %c0_6 = arith.constant 0 : index
    %c2 = arith.constant 2 : index
    %7 = memref.load %arg1[%c0_6, %c2] : memref<8x3xi32, #tpu.memory_space<smem>>
    %8 = arith.addi %6, %7 : i32
    %c1_i32 = arith.constant 1 : i32
    %c0_i32_7 = arith.constant 0 : i32
    %c0_i32_8 = arith.constant 0 : i32
    %9 = tpu.memref_slice %arg5[%8, %c0_i32_8] : memref<16x128xf32, #tpu.memory_space<any>> -> memref<1x128xf32, #tpu.memory_space<any>>
    %c0_i32_9 = arith.constant 0 : i32
    %c0_i32_10 = arith.constant 0 : i32
    %10 = tpu.memref_slice %arg9[%c0_i32_9, %c0_i32_10] : memref<8x128xf32, #tpu.memory_space<vmem>> -> memref<1x128xf32, #tpu.memory_space<vmem>>
    %11 = tpu.memref_slice %arg10[%c1_i32, %c0_i32_7] : memref<2x8x!tpu.dma_semaphore, #tpu.memory_space<semaphore_mem>> -> memref<1x1x!tpu.dma_semaphore, #tpu.memory_space<semaphore_mem>>
    %12 = tpu.memref_squeeze %11 : memref<1x1x!tpu.dma_semaphore, #tpu.memory_space<semaphore_mem>> -> memref<!tpu.dma_semaphore, #tpu.memory_space<semaphore_mem>>
    tpu.enqueue_dma source(%9 : memref<1x128xf32, #tpu.memory_space<any>>) target(%10 : memref<1x128xf32, #tpu.memory_space<vmem>>) target_semaphore(%12 : memref<!tpu.dma_semaphore, #tpu.memory_space<semaphore_mem>>)
    %c1_11 = arith.constant 1 : index
    %c0_12 = arith.constant 0 : index
    %13 = memref.load %arg1[%c1_11, %c0_12] : memref<8x3xi32, #tpu.memory_space<smem>>
    %c0_i32_13 = arith.constant 0 : i32
    %c1_i32_14 = arith.constant 1 : i32
    %c0_i32_15 = arith.constant 0 : i32
    %14 = tpu.memref_slice %arg6[%13, %c0_i32_15] : memref<190662x32xf32, #tpu.memory_space<any>> -> memref<1x32xf32, #tpu.memory_space<any>>
    %c1_i32_16 = arith.constant 1 : i32
    %c0_i32_17 = arith.constant 0 : i32
    %15 = tpu.memref_slice %arg8[%c1_i32_16, %c0_i32_17] : memref<8x32xf32, #tpu.memory_space<vmem>> -> memref<1x32xf32, #tpu.memory_space<vmem>>
    %16 = tpu.memref_slice %arg10[%c0_i32_13, %c1_i32_14] : memref<2x8x!tpu.dma_semaphore, #tpu.memory_space<semaphore_mem>> -> memref<1x1x!tpu.dma_semaphore, #tpu.memory_space<semaphore_mem>>
    %17 = tpu.memref_squeeze %16 : memref<1x1x!tpu.dma_semaphore, #tpu.memory_space<semaphore_mem>> -> memref<!tpu.dma_semaphore, #tpu.memory_space<semaphore_mem>>
    tpu.enqueue_dma source(%14 : memref<1x32xf32, #tpu.memory_space<any>>) target(%15 : memref<1x32xf32, #tpu.memory_space<vmem>>) target_semaphore(%17 : memref<!tpu.dma_semaphore, #tpu.memory_space<semaphore_mem>>)
    %c1_18 = arith.constant 1 : index
    %c1_19 = arith.constant 1 : index
    %18 = memref.load %arg1[%c1_18, %c1_19] : memref<8x3xi32, #tpu.memory_space<smem>>
    %c2_i32_20 = arith.constant 2 : i32
    %19 = arith.muli %18, %c2_i32_20 : i32
    %c1_21 = arith.constant 1 : index
    %c2_22 = arith.constant 2 : index
    %20 = memref.load %arg1[%c1_21, %c2_22] : memref<8x3xi32, #tpu.memory_space<smem>>
    %21 = arith.addi %19, %20 : i32
    %c1_i32_23 = arith.constant 1 : i32
    %c1_i32_24 = arith.constant 1 : i32
    %c0_i32_25 = arith.constant 0 : i32
    %22 = tpu.memref_slice %arg5[%21, %c0_i32_25] : memref<16x128xf32, #tpu.memory_space<any>> -> memref<1x128xf32, #tpu.memory_space<any>>
    %c1_i32_26 = arith.constant 1 : i32
    %c0_i32_27 = arith.constant 0 : i32
    %23 = tpu.memref_slice %arg9[%c1_i32_26, %c0_i32_27] : memref<8x128xf32, #tpu.memory_space<vmem>> -> memref<1x128xf32, #tpu.memory_space<vmem>>
    %24 = tpu.memref_slice %arg10[%c1_i32_23, %c1_i32_24] : memref<2x8x!tpu.dma_semaphore, #tpu.memory_space<semaphore_mem>> -> memref<1x1x!tpu.dma_semaphore, #tpu.memory_space<semaphore_mem>>
    %25 = tpu.memref_squeeze %24 : memref<1x1x!tpu.dma_semaphore, #tpu.memory_space<semaphore_mem>> -> memref<!tpu.dma_semaphore, #tpu.memory_space<semaphore_mem>>
    tpu.enqueue_dma source(%22 : memref<1x128xf32, #tpu.memory_space<any>>) target(%23 : memref<1x128xf32, #tpu.memory_space<vmem>>) target_semaphore(%25 : memref<!tpu.dma_semaphore, #tpu.memory_space<semaphore_mem>>)
    %c2_28 = arith.constant 2 : index
    %c0_29 = arith.constant 0 : index
    %26 = memref.load %arg1[%c2_28, %c0_29] : memref<8x3xi32, #tpu.memory_space<smem>>
    %c0_i32_30 = arith.constant 0 : i32
    %c2_i32_31 = arith.constant 2 : i32
    %c0_i32_32 = arith.constant 0 : i32
    %27 = tpu.memref_slice %arg6[%26, %c0_i32_32] : memref<190662x32xf32, #tpu.memory_space<any>> -> memref<1x32xf32, #tpu.memory_space<any>>
    %c2_i32_33 = arith.constant 2 : i32
    %c0_i32_34 = arith.constant 0 : i32
    %28 = tpu.memref_slice %arg8[%c2_i32_33, %c0_i32_34] : memref<8x32xf32, #tpu.memory_space<vmem>> -> memref<1x32xf32, #tpu.memory_space<vmem>>
    %29 = tpu.memref_slice %arg10[%c0_i32_30, %c2_i32_31] : memref<2x8x!tpu.dma_semaphore, #tpu.memory_space<semaphore_mem>> -> memref<1x1x!tpu.dma_semaphore, #tpu.memory_space<semaphore_mem>>
    %30 = tpu.memref_squeeze %29 : memref<1x1x!tpu.dma_semaphore, #tpu.memory_space<semaphore_mem>> -> memref<!tpu.dma_semaphore, #tpu.memory_space<semaphore_mem>>
    tpu.enqueue_dma source(%27 : memref<1x32xf32, #tpu.memory_space<any>>) target(%28 : memref<1x32xf32, #tpu.memory_space<vmem>>) target_semaphore(%30 : memref<!tpu.dma_semaphore, #tpu.memory_space<semaphore_mem>>)
    %c2_35 = arith.constant 2 : index
    %c1_36 = arith.constant 1 : index
    %31 = memref.load %arg1[%c2_35, %c1_36] : memref<8x3xi32, #tpu.memory_space<smem>>
    %c2_i32_37 = arith.constant 2 : i32
    %32 = arith.muli %31, %c2_i32_37 : i32
    %c2_38 = arith.constant 2 : index
    %c2_39 = arith.constant 2 : index
    %33 = memref.load %arg1[%c2_38, %c2_39] : memref<8x3xi32, #tpu.memory_space<smem>>
    %34 = arith.addi %32, %33 : i32
    %c1_i32_40 = arith.constant 1 : i32
    %c2_i32_41 = arith.constant 2 : i32
    %c0_i32_42 = arith.constant 0 : i32
    %35 = tpu.memref_slice %arg5[%34, %c0_i32_42] : memref<16x128xf32, #tpu.memory_space<any>> -> memref<1x128xf32, #tpu.memory_space<any>>
    %c2_i32_43 = arith.constant 2 : i32
    %c0_i32_44 = arith.constant 0 : i32
    %36 = tpu.memref_slice %arg9[%c2_i32_43, %c0_i32_44] : memref<8x128xf32, #tpu.memory_space<vmem>> -> memref<1x128xf32, #tpu.memory_space<vmem>>
    %37 = tpu.memref_slice %arg10[%c1_i32_40, %c2_i32_41] : memref<2x8x!tpu.dma_semaphore, #tpu.memory_space<semaphore_mem>> -> memref<1x1x!tpu.dma_semaphore, #tpu.memory_space<semaphore_mem>>
    %38 = tpu.memref_squeeze %37 : memref<1x1x!tpu.dma_semaphore, #tpu.memory_space<semaphore_mem>> -> memref<!tpu.dma_semaphore, #tpu.memory_space<semaphore_mem>>
    tpu.enqueue_dma source(%35 : memref<1x128xf32, #tpu.memory_space<any>>) target(%36 : memref<1x128xf32, #tpu.memory_space<vmem>>) target_semaphore(%38 : memref<!tpu.dma_semaphore, #tpu.memory_space<semaphore_mem>>)
    %c3 = arith.constant 3 : index
    %c0_45 = arith.constant 0 : index
    %39 = memref.load %arg1[%c3, %c0_45] : memref<8x3xi32, #tpu.memory_space<smem>>
    %c0_i32_46 = arith.constant 0 : i32
    %c3_i32 = arith.constant 3 : i32
    %c0_i32_47 = arith.constant 0 : i32
    %40 = tpu.memref_slice %arg6[%39, %c0_i32_47] : memref<190662x32xf32, #tpu.memory_space<any>> -> memref<1x32xf32, #tpu.memory_space<any>>
    %c3_i32_48 = arith.constant 3 : i32
    %c0_i32_49 = arith.constant 0 : i32
    %41 = tpu.memref_slice %arg8[%c3_i32_48, %c0_i32_49] : memref<8x32xf32, #tpu.memory_space<vmem>> -> memref<1x32xf32, #tpu.memory_space<vmem>>
    %42 = tpu.memref_slice %arg10[%c0_i32_46, %c3_i32] : memref<2x8x!tpu.dma_semaphore, #tpu.memory_space<semaphore_mem>> -> memref<1x1x!tpu.dma_semaphore, #tpu.memory_space<semaphore_mem>>
    %43 = tpu.memref_squeeze %42 : memref<1x1x!tpu.dma_semaphore, #tpu.memory_space<semaphore_mem>> -> memref<!tpu.dma_semaphore, #tpu.memory_space<semaphore_mem>>
    tpu.enqueue_dma source(%40 : memref<1x32xf32, #tpu.memory_space<any>>) target(%41 : memref<1x32xf32, #tpu.memory_space<vmem>>) target_semaphore(%43 : memref<!tpu.dma_semaphore, #tpu.memory_space<semaphore_mem>>)
    %c3_50 = arith.constant 3 : index
    %c1_51 = arith.constant 1 : index
    %44 = memref.load %arg1[%c3_50, %c1_51] : memref<8x3xi32, #tpu.memory_space<smem>>
    %c2_i32_52 = arith.constant 2 : i32
    %45 = arith.muli %44, %c2_i32_52 : i32
    %c3_53 = arith.constant 3 : index
    %c2_54 = arith.constant 2 : index
    %46 = memref.load %arg1[%c3_53, %c2_54] : memref<8x3xi32, #tpu.memory_space<smem>>
    %47 = arith.addi %45, %46 : i32
    %c1_i32_55 = arith.constant 1 : i32
    %c3_i32_56 = arith.constant 3 : i32
    %c0_i32_57 = arith.constant 0 : i32
    %48 = tpu.memref_slice %arg5[%47, %c0_i32_57] : memref<16x128xf32, #tpu.memory_space<any>> -> memref<1x128xf32, #tpu.memory_space<any>>
    %c3_i32_58 = arith.constant 3 : i32
    %c0_i32_59 = arith.constant 0 : i32
    %49 = tpu.memref_slice %arg9[%c3_i32_58, %c0_i32_59] : memref<8x128xf32, #tpu.memory_space<vmem>> -> memref<1x128xf32, #tpu.memory_space<vmem>>
    %50 = tpu.memref_slice %arg10[%c1_i32_55, %c3_i32_56] : memref<2x8x!tpu.dma_semaphore, #tpu.memory_space<semaphore_mem>> -> memref<1x1x!tpu.dma_semaphore, #tpu.memory_space<semaphore_mem>>
    %51 = tpu.memref_squeeze %50 : memref<1x1x!tpu.dma_semaphore, #tpu.memory_space<semaphore_mem>> -> memref<!tpu.dma_semaphore, #tpu.memory_space<semaphore_mem>>
    tpu.enqueue_dma source(%48 : memref<1x128xf32, #tpu.memory_space<any>>) target(%49 : memref<1x128xf32, #tpu.memory_space<vmem>>) target_semaphore(%51 : memref<!tpu.dma_semaphore, #tpu.memory_space<semaphore_mem>>)
    %c4 = arith.constant 4 : index
    %c0_60 = arith.constant 0 : index
    %52 = memref.load %arg1[%c4, %c0_60] : memref<8x3xi32, #tpu.memory_space<smem>>
    %c0_i32_61 = arith.constant 0 : i32
    %c4_i32 = arith.constant 4 : i32
    %c0_i32_62 = arith.constant 0 : i32
    %53 = tpu.memref_slice %arg6[%52, %c0_i32_62] : memref<190662x32xf32, #tpu.memory_space<any>> -> memref<1x32xf32, #tpu.memory_space<any>>
    %c4_i32_63 = arith.constant 4 : i32
    %c0_i32_64 = arith.constant 0 : i32
    %54 = tpu.memref_slice %arg8[%c4_i32_63, %c0_i32_64] : memref<8x32xf32, #tpu.memory_space<vmem>> -> memref<1x32xf32, #tpu.memory_space<vmem>>
    %55 = tpu.memref_slice %arg10[%c0_i32_61, %c4_i32] : memref<2x8x!tpu.dma_semaphore, #tpu.memory_space<semaphore_mem>> -> memref<1x1x!tpu.dma_semaphore, #tpu.memory_space<semaphore_mem>>
    %56 = tpu.memref_squeeze %55 : memref<1x1x!tpu.dma_semaphore, #tpu.memory_space<semaphore_mem>> -> memref<!tpu.dma_semaphore, #tpu.memory_space<semaphore_mem>>
    tpu.enqueue_dma source(%53 : memref<1x32xf32, #tpu.memory_space<any>>) target(%54 : memref<1x32xf32, #tpu.memory_space<vmem>>) target_semaphore(%56 : memref<!tpu.dma_semaphore, #tpu.memory_space<semaphore_mem>>)
    %c4_65 = arith.constant 4 : index
    %c1_66 = arith.constant 1 : index
    %57 = memref.load %arg1[%c4_65, %c1_66] : memref<8x3xi32, #tpu.memory_space<smem>>
    %c2_i32_67 = arith.constant 2 : i32
    %58 = arith.muli %57, %c2_i32_67 : i32
    %c4_68 = arith.constant 4 : index
    %c2_69 = arith.constant 2 : index
    %59 = memref.load %arg1[%c4_68, %c2_69] : memref<8x3xi32, #tpu.memory_space<smem>>
    %60 = arith.addi %58, %59 : i32
    %c1_i32_70 = arith.constant 1 : i32
    %c4_i32_71 = arith.constant 4 : i32
    %c0_i32_72 = arith.constant 0 : i32
    %61 = tpu.memref_slice %arg5[%60, %c0_i32_72] : memref<16x128xf32, #tpu.memory_space<any>> -> memref<1x128xf32, #tpu.memory_space<any>>
    %c4_i32_73 = arith.constant 4 : i32
    %c0_i32_74 = arith.constant 0 : i32
    %62 = tpu.memref_slice %arg9[%c4_i32_73, %c0_i32_74] : memref<8x128xf32, #tpu.memory_space<vmem>> -> memref<1x128xf32, #tpu.memory_space<vmem>>
    %63 = tpu.memref_slice %arg10[%c1_i32_70, %c4_i32_71] : memref<2x8x!tpu.dma_semaphore, #tpu.memory_space<semaphore_mem>> -> memref<1x1x!tpu.dma_semaphore, #tpu.memory_space<semaphore_mem>>
    %64 = tpu.memref_squeeze %63 : memref<1x1x!tpu.dma_semaphore, #tpu.memory_space<semaphore_mem>> -> memref<!tpu.dma_semaphore, #tpu.memory_space<semaphore_mem>>
    tpu.enqueue_dma source(%61 : memref<1x128xf32, #tpu.memory_space<any>>) target(%62 : memref<1x128xf32, #tpu.memory_space<vmem>>) target_semaphore(%64 : memref<!tpu.dma_semaphore, #tpu.memory_space<semaphore_mem>>)
    %c5 = arith.constant 5 : index
    %c0_75 = arith.constant 0 : index
    %65 = memref.load %arg1[%c5, %c0_75] : memref<8x3xi32, #tpu.memory_space<smem>>
    %c0_i32_76 = arith.constant 0 : i32
    %c5_i32 = arith.constant 5 : i32
    %c0_i32_77 = arith.constant 0 : i32
    %66 = tpu.memref_slice %arg6[%65, %c0_i32_77] : memref<190662x32xf32, #tpu.memory_space<any>> -> memref<1x32xf32, #tpu.memory_space<any>>
    %c5_i32_78 = arith.constant 5 : i32
    %c0_i32_79 = arith.constant 0 : i32
    %67 = tpu.memref_slice %arg8[%c5_i32_78, %c0_i32_79] : memref<8x32xf32, #tpu.memory_space<vmem>> -> memref<1x32xf32, #tpu.memory_space<vmem>>
    %68 = tpu.memref_slice %arg10[%c0_i32_76, %c5_i32] : memref<2x8x!tpu.dma_semaphore, #tpu.memory_space<semaphore_mem>> -> memref<1x1x!tpu.dma_semaphore, #tpu.memory_space<semaphore_mem>>
    %69 = tpu.memref_squeeze %68 : memref<1x1x!tpu.dma_semaphore, #tpu.memory_space<semaphore_mem>> -> memref<!tpu.dma_semaphore, #tpu.memory_space<semaphore_mem>>
    tpu.enqueue_dma source(%66 : memref<1x32xf32, #tpu.memory_space<any>>) target(%67 : memref<1x32xf32, #tpu.memory_space<vmem>>) target_semaphore(%69 : memref<!tpu.dma_semaphore, #tpu.memory_space<semaphore_mem>>)
    %c5_80 = arith.constant 5 : index
    %c1_81 = arith.constant 1 : index
    %70 = memref.load %arg1[%c5_80, %c1_81] : memref<8x3xi32, #tpu.memory_space<smem>>
    %c2_i32_82 = arith.constant 2 : i32
    %71 = arith.muli %70, %c2_i32_82 : i32
    %c5_83 = arith.constant 5 : index
    %c2_84 = arith.constant 2 : index
    %72 = memref.load %arg1[%c5_83, %c2_84] : memref<8x3xi32, #tpu.memory_space<smem>>
    %73 = arith.addi %71, %72 : i32
    %c1_i32_85 = arith.constant 1 : i32
    %c5_i32_86 = arith.constant 5 : i32
    %c0_i32_87 = arith.constant 0 : i32
    %74 = tpu.memref_slice %arg5[%73, %c0_i32_87] : memref<16x128xf32, #tpu.memory_space<any>> -> memref<1x128xf32, #tpu.memory_space<any>>
    %c5_i32_88 = arith.constant 5 : i32
    %c0_i32_89 = arith.constant 0 : i32
    %75 = tpu.memref_slice %arg9[%c5_i32_88, %c0_i32_89] : memref<8x128xf32, #tpu.memory_space<vmem>> -> memref<1x128xf32, #tpu.memory_space<vmem>>
    %76 = tpu.memref_slice %arg10[%c1_i32_85, %c5_i32_86] : memref<2x8x!tpu.dma_semaphore, #tpu.memory_space<semaphore_mem>> -> memref<1x1x!tpu.dma_semaphore, #tpu.memory_space<semaphore_mem>>
    %77 = tpu.memref_squeeze %76 : memref<1x1x!tpu.dma_semaphore, #tpu.memory_space<semaphore_mem>> -> memref<!tpu.dma_semaphore, #tpu.memory_space<semaphore_mem>>
    tpu.enqueue_dma source(%74 : memref<1x128xf32, #tpu.memory_space<any>>) target(%75 : memref<1x128xf32, #tpu.memory_space<vmem>>) target_semaphore(%77 : memref<!tpu.dma_semaphore, #tpu.memory_space<semaphore_mem>>)
    %c6 = arith.constant 6 : index
    %c0_90 = arith.constant 0 : index
    %78 = memref.load %arg1[%c6, %c0_90] : memref<8x3xi32, #tpu.memory_space<smem>>
    %c0_i32_91 = arith.constant 0 : i32
    %c6_i32 = arith.constant 6 : i32
    %c0_i32_92 = arith.constant 0 : i32
    %79 = tpu.memref_slice %arg6[%78, %c0_i32_92] : memref<190662x32xf32, #tpu.memory_space<any>> -> memref<1x32xf32, #tpu.memory_space<any>>
    %c6_i32_93 = arith.constant 6 : i32
    %c0_i32_94 = arith.constant 0 : i32
    %80 = tpu.memref_slice %arg8[%c6_i32_93, %c0_i32_94] : memref<8x32xf32, #tpu.memory_space<vmem>> -> memref<1x32xf32, #tpu.memory_space<vmem>>
    %81 = tpu.memref_slice %arg10[%c0_i32_91, %c6_i32] : memref<2x8x!tpu.dma_semaphore, #tpu.memory_space<semaphore_mem>> -> memref<1x1x!tpu.dma_semaphore, #tpu.memory_space<semaphore_mem>>
    %82 = tpu.memref_squeeze %81 : memref<1x1x!tpu.dma_semaphore, #tpu.memory_space<semaphore_mem>> -> memref<!tpu.dma_semaphore, #tpu.memory_space<semaphore_mem>>
    tpu.enqueue_dma source(%79 : memref<1x32xf32, #tpu.memory_space<any>>) target(%80 : memref<1x32xf32, #tpu.memory_space<vmem>>) target_semaphore(%82 : memref<!tpu.dma_semaphore, #tpu.memory_space<semaphore_mem>>)
    %c6_95 = arith.constant 6 : index
    %c1_96 = arith.constant 1 : index
    %83 = memref.load %arg1[%c6_95, %c1_96] : memref<8x3xi32, #tpu.memory_space<smem>>
    %c2_i32_97 = arith.constant 2 : i32
    %84 = arith.muli %83, %c2_i32_97 : i32
    %c6_98 = arith.constant 6 : index
    %c2_99 = arith.constant 2 : index
    %85 = memref.load %arg1[%c6_98, %c2_99] : memref<8x3xi32, #tpu.memory_space<smem>>
    %86 = arith.addi %84, %85 : i32
    %c1_i32_100 = arith.constant 1 : i32
    %c6_i32_101 = arith.constant 6 : i32
    %c0_i32_102 = arith.constant 0 : i32
    %87 = tpu.memref_slice %arg5[%86, %c0_i32_102] : memref<16x128xf32, #tpu.memory_space<any>> -> memref<1x128xf32, #tpu.memory_space<any>>
    %c6_i32_103 = arith.constant 6 : i32
    %c0_i32_104 = arith.constant 0 : i32
    %88 = tpu.memref_slice %arg9[%c6_i32_103, %c0_i32_104] : memref<8x128xf32, #tpu.memory_space<vmem>> -> memref<1x128xf32, #tpu.memory_space<vmem>>
    %89 = tpu.memref_slice %arg10[%c1_i32_100, %c6_i32_101] : memref<2x8x!tpu.dma_semaphore, #tpu.memory_space<semaphore_mem>> -> memref<1x1x!tpu.dma_semaphore, #tpu.memory_space<semaphore_mem>>
    %90 = tpu.memref_squeeze %89 : memref<1x1x!tpu.dma_semaphore, #tpu.memory_space<semaphore_mem>> -> memref<!tpu.dma_semaphore, #tpu.memory_space<semaphore_mem>>
    tpu.enqueue_dma source(%87 : memref<1x128xf32, #tpu.memory_space<any>>) target(%88 : memref<1x128xf32, #tpu.memory_space<vmem>>) target_semaphore(%90 : memref<!tpu.dma_semaphore, #tpu.memory_space<semaphore_mem>>)
    %c7 = arith.constant 7 : index
    %c0_105 = arith.constant 0 : index
    %91 = memref.load %arg1[%c7, %c0_105] : memref<8x3xi32, #tpu.memory_space<smem>>
    %c0_i32_106 = arith.constant 0 : i32
    %c7_i32 = arith.constant 7 : i32
    %c0_i32_107 = arith.constant 0 : i32
    %92 = tpu.memref_slice %arg6[%91, %c0_i32_107] : memref<190662x32xf32, #tpu.memory_space<any>> -> memref<1x32xf32, #tpu.memory_space<any>>
    %c7_i32_108 = arith.constant 7 : i32
    %c0_i32_109 = arith.constant 0 : i32
    %93 = tpu.memref_slice %arg8[%c7_i32_108, %c0_i32_109] : memref<8x32xf32, #tpu.memory_space<vmem>> -> memref<1x32xf32, #tpu.memory_space<vmem>>
    %94 = tpu.memref_slice %arg10[%c0_i32_106, %c7_i32] : memref<2x8x!tpu.dma_semaphore, #tpu.memory_space<semaphore_mem>> -> memref<1x1x!tpu.dma_semaphore, #tpu.memory_space<semaphore_mem>>
    %95 = tpu.memref_squeeze %94 : memref<1x1x!tpu.dma_semaphore, #tpu.memory_space<semaphore_mem>> -> memref<!tpu.dma_semaphore, #tpu.memory_space<semaphore_mem>>
    tpu.enqueue_dma source(%92 : memref<1x32xf32, #tpu.memory_space<any>>) target(%93 : memref<1x32xf32, #tpu.memory_space<vmem>>) target_semaphore(%95 : memref<!tpu.dma_semaphore, #tpu.memory_space<semaphore_mem>>)
    %c7_110 = arith.constant 7 : index
    %c1_111 = arith.constant 1 : index
    %96 = memref.load %arg1[%c7_110, %c1_111] : memref<8x3xi32, #tpu.memory_space<smem>>
    %c2_i32_112 = arith.constant 2 : i32
    %97 = arith.muli %96, %c2_i32_112 : i32
    %c7_113 = arith.constant 7 : index
    %c2_114 = arith.constant 2 : index
    %98 = memref.load %arg1[%c7_113, %c2_114] : memref<8x3xi32, #tpu.memory_space<smem>>
    %99 = arith.addi %97, %98 : i32
    %c1_i32_115 = arith.constant 1 : i32
    %c7_i32_116 = arith.constant 7 : i32
    %c0_i32_117 = arith.constant 0 : i32
    %100 = tpu.memref_slice %arg5[%99, %c0_i32_117] : memref<16x128xf32, #tpu.memory_space<any>> -> memref<1x128xf32, #tpu.memory_space<any>>
    %c7_i32_118 = arith.constant 7 : i32
    %c0_i32_119 = arith.constant 0 : i32
    %101 = tpu.memref_slice %arg9[%c7_i32_118, %c0_i32_119] : memref<8x128xf32, #tpu.memory_space<vmem>> -> memref<1x128xf32, #tpu.memory_space<vmem>>
    %102 = tpu.memref_slice %arg10[%c1_i32_115, %c7_i32_116] : memref<2x8x!tpu.dma_semaphore, #tpu.memory_space<semaphore_mem>> -> memref<1x1x!tpu.dma_semaphore, #tpu.memory_space<semaphore_mem>>
    %103 = tpu.memref_squeeze %102 : memref<1x1x!tpu.dma_semaphore, #tpu.memory_space<semaphore_mem>> -> memref<!tpu.dma_semaphore, #tpu.memory_space<semaphore_mem>>
    tpu.enqueue_dma source(%100 : memref<1x128xf32, #tpu.memory_space<any>>) target(%101 : memref<1x128xf32, #tpu.memory_space<vmem>>) target_semaphore(%103 : memref<!tpu.dma_semaphore, #tpu.memory_space<semaphore_mem>>)
    %c0_120 = arith.constant 0 : index
    %c0_121 = arith.constant 0 : index
    %104 = vector.load %arg2[%c0_120, %c0_121] : memref<8x32xf32, #tpu.memory_space<vmem>>, vector<8x32xf32>
    %cst = arith.constant dense<0.000000e+00> : vector<32xf32>
    %105 = vector.multi_reduction <add>, %104, %cst [0] : vector<8x32xf32> to vector<32xf32>
    %106 = vector.shape_cast %105 : vector<32xf32> to vector<1x32xf32>
    %cst_122 = arith.constant 8.000000e+00 : f32
    %107 = vector.broadcast %cst_122 : f32 to vector<1x32xf32>
    %108 = arith.divf %106, %107 : vector<1x32xf32>
    %109 = arith.mulf %104, %104 : vector<8x32xf32>
    %cst_123 = arith.constant dense<0.000000e+00> : vector<32xf32>
    %110 = vector.multi_reduction <add>, %109, %cst_123 [0] : vector<8x32xf32> to vector<32xf32>
    %111 = vector.shape_cast %110 : vector<32xf32> to vector<1x32xf32>
    %cst_124 = arith.constant 8.000000e+00 : f32
    %112 = vector.broadcast %cst_124 : f32 to vector<1x32xf32>
    %113 = arith.divf %111, %112 : vector<1x32xf32>
    %114 = arith.mulf %108, %108 : vector<1x32xf32>
    %115 = arith.subf %113, %114 : vector<1x32xf32>
    %cst_125 = arith.constant 0.000000e+00 : f32
    %116 = vector.broadcast %cst_125 : f32 to vector<1x32xf32>
    %117 = arith.maximumf %115, %116 : vector<1x32xf32>
    %c0_126 = arith.constant 0 : index
    %c0_127 = arith.constant 0 : index
    %118 = vector.load %arg3[%c0_126, %c0_127] : memref<16x32xf32, #tpu.memory_space<vmem>>, vector<16x32xf32>
    %119 = vector.extract_strided_slice %118 {offsets = [0, 0], sizes = [1, 32], strides = [1, 1]} : vector<16x32xf32> to vector<1x32xf32>
    %120 = vector.extract_strided_slice %118 {offsets = [1, 0], sizes = [1, 32], strides = [1, 1]} : vector<16x32xf32> to vector<1x32xf32>
    %121 = vector.broadcast %108 : vector<1x32xf32> to vector<8x32xf32>
    %122 = arith.subf %104, %121 : vector<8x32xf32>
    %cst_128 = arith.constant 9.99999974E-6 : f32
    %123 = vector.broadcast %cst_128 : f32 to vector<1x32xf32>
    %124 = arith.addf %117, %123 : vector<1x32xf32>
    %125 = math.rsqrt %124 : vector<1x32xf32>
    %126 = vector.broadcast %125 : vector<1x32xf32> to vector<8x32xf32>
    %127 = arith.mulf %122, %126 : vector<8x32xf32>
    %128 = vector.broadcast %119 : vector<1x32xf32> to vector<8x32xf32>
    %129 = arith.mulf %127, %128 : vector<8x32xf32>
    %130 = vector.broadcast %120 : vector<1x32xf32> to vector<8x32xf32>
    %131 = arith.addf %129, %130 : vector<8x32xf32>
    %c32 = arith.constant 32 : index
    %c0_129 = arith.constant 0 : index
    %132 = vector.load %arg4[%c32, %c0_129] : memref<64x128xf32, #tpu.memory_space<vmem>>, vector<32x128xf32>
    %cst_130 = arith.constant dense<0.000000e+00> : vector<8x128xf32>
    %133 = tpu.matmul %131, %132, %cst_130 {dimension_numbers = #tpu.dot_dimension_numbers<[1], [0], [0], [1], [0, 0, 1, 1], [], []>} : vector<8x32xf32>, vector<32x128xf32>, vector<8x128xf32> -> vector<8x128xf32>
    %c0_i32_131 = arith.constant 0 : i32
    %c0_i32_132 = arith.constant 0 : i32
    %c0_i32_133 = arith.constant 0 : i32
    %134 = tpu.memref_slice %arg6[%0, %c0_i32_133] : memref<190662x32xf32, #tpu.memory_space<any>> -> memref<1x32xf32, #tpu.memory_space<any>>
    %c0_i32_134 = arith.constant 0 : i32
    %c0_i32_135 = arith.constant 0 : i32
    %135 = tpu.memref_slice %arg8[%c0_i32_134, %c0_i32_135] : memref<8x32xf32, #tpu.memory_space<vmem>> -> memref<1x32xf32, #tpu.memory_space<vmem>>
    %136 = tpu.memref_slice %arg10[%c0_i32_131, %c0_i32_132] : memref<2x8x!tpu.dma_semaphore, #tpu.memory_space<semaphore_mem>> -> memref<1x1x!tpu.dma_semaphore, #tpu.memory_space<semaphore_mem>>
    %137 = tpu.memref_squeeze %136 : memref<1x1x!tpu.dma_semaphore, #tpu.memory_space<semaphore_mem>> -> memref<!tpu.dma_semaphore, #tpu.memory_space<semaphore_mem>>
    tpu.wait_dma2 semaphore(%137 : memref<!tpu.dma_semaphore, #tpu.memory_space<semaphore_mem>>) src(%134 : memref<1x32xf32, #tpu.memory_space<any>>) dst(%135 : memref<1x32xf32, #tpu.memory_space<vmem>>)
    %c1_i32_136 = arith.constant 1 : i32
    %c0_i32_137 = arith.constant 0 : i32
    %c0_i32_138 = arith.constant 0 : i32
    %138 = tpu.memref_slice %arg5[%8, %c0_i32_138] : memref<16x128xf32, #tpu.memory_space<any>> -> memref<1x128xf32, #tpu.memory_space<any>>
    %c0_i32_139 = arith.constant 0 : i32
    %c0_i32_140 = arith.constant 0 : i32
    %139 = tpu.memref_slice %arg9[%c0_i32_139, %c0_i32_140] : memref<8x128xf32, #tpu.memory_space<vmem>> -> memref<1x128xf32, #tpu.memory_space<vmem>>
    %140 = tpu.memref_slice %arg10[%c1_i32_136, %c0_i32_137] : memref<2x8x!tpu.dma_semaphore, #tpu.memory_space<semaphore_mem>> -> memref<1x1x!tpu.dma_semaphore, #tpu.memory_space<semaphore_mem>>
    %141 = tpu.memref_squeeze %140 : memref<1x1x!tpu.dma_semaphore, #tpu.memory_space<semaphore_mem>> -> memref<!tpu.dma_semaphore, #tpu.memory_space<semaphore_mem>>
    tpu.wait_dma2 semaphore(%141 : memref<!tpu.dma_semaphore, #tpu.memory_space<semaphore_mem>>) src(%138 : memref<1x128xf32, #tpu.memory_space<any>>) dst(%139 : memref<1x128xf32, #tpu.memory_space<vmem>>)
    %c0_i32_141 = arith.constant 0 : i32
    %c1_i32_142 = arith.constant 1 : i32
    %c0_i32_143 = arith.constant 0 : i32
    %142 = tpu.memref_slice %arg6[%13, %c0_i32_143] : memref<190662x32xf32, #tpu.memory_space<any>> -> memref<1x32xf32, #tpu.memory_space<any>>
    %c1_i32_144 = arith.constant 1 : i32
    %c0_i32_145 = arith.constant 0 : i32
    %143 = tpu.memref_slice %arg8[%c1_i32_144, %c0_i32_145] : memref<8x32xf32, #tpu.memory_space<vmem>> -> memref<1x32xf32, #tpu.memory_space<vmem>>
    %144 = tpu.memref_slice %arg10[%c0_i32_141, %c1_i32_142] : memref<2x8x!tpu.dma_semaphore, #tpu.memory_space<semaphore_mem>> -> memref<1x1x!tpu.dma_semaphore, #tpu.memory_space<semaphore_mem>>
    %145 = tpu.memref_squeeze %144 : memref<1x1x!tpu.dma_semaphore, #tpu.memory_space<semaphore_mem>> -> memref<!tpu.dma_semaphore, #tpu.memory_space<semaphore_mem>>
    tpu.wait_dma2 semaphore(%145 : memref<!tpu.dma_semaphore, #tpu.memory_space<semaphore_mem>>) src(%142 : memref<1x32xf32, #tpu.memory_space<any>>) dst(%143 : memref<1x32xf32, #tpu.memory_space<vmem>>)
    %c1_i32_146 = arith.constant 1 : i32
    %c1_i32_147 = arith.constant 1 : i32
    %c0_i32_148 = arith.constant 0 : i32
    %146 = tpu.memref_slice %arg5[%21, %c0_i32_148] : memref<16x128xf32, #tpu.memory_space<any>> -> memref<1x128xf32, #tpu.memory_space<any>>
    %c1_i32_149 = arith.constant 1 : i32
    %c0_i32_150 = arith.constant 0 : i32
    %147 = tpu.memref_slice %arg9[%c1_i32_149, %c0_i32_150] : memref<8x128xf32, #tpu.memory_space<vmem>> -> memref<1x128xf32, #tpu.memory_space<vmem>>
    %148 = tpu.memref_slice %arg10[%c1_i32_146, %c1_i32_147] : memref<2x8x!tpu.dma_semaphore, #tpu.memory_space<semaphore_mem>> -> memref<1x1x!tpu.dma_semaphore, #tpu.memory_space<semaphore_mem>>
    %149 = tpu.memref_squeeze %148 : memref<1x1x!tpu.dma_semaphore, #tpu.memory_space<semaphore_mem>> -> memref<!tpu.dma_semaphore, #tpu.memory_space<semaphore_mem>>
    tpu.wait_dma2 semaphore(%149 : memref<!tpu.dma_semaphore, #tpu.memory_space<semaphore_mem>>) src(%146 : memref<1x128xf32, #tpu.memory_space<any>>) dst(%147 : memref<1x128xf32, #tpu.memory_space<vmem>>)
    %c0_i32_151 = arith.constant 0 : i32
    %c2_i32_152 = arith.constant 2 : i32
    %c0_i32_153 = arith.constant 0 : i32
    %150 = tpu.memref_slice %arg6[%26, %c0_i32_153] : memref<190662x32xf32, #tpu.memory_space<any>> -> memref<1x32xf32, #tpu.memory_space<any>>
    %c2_i32_154 = arith.constant 2 : i32
    %c0_i32_155 = arith.constant 0 : i32
    %151 = tpu.memref_slice %arg8[%c2_i32_154, %c0_i32_155] : memref<8x32xf32, #tpu.memory_space<vmem>> -> memref<1x32xf32, #tpu.memory_space<vmem>>
    %152 = tpu.memref_slice %arg10[%c0_i32_151, %c2_i32_152] : memref<2x8x!tpu.dma_semaphore, #tpu.memory_space<semaphore_mem>> -> memref<1x1x!tpu.dma_semaphore, #tpu.memory_space<semaphore_mem>>
    %153 = tpu.memref_squeeze %152 : memref<1x1x!tpu.dma_semaphore, #tpu.memory_space<semaphore_mem>> -> memref<!tpu.dma_semaphore, #tpu.memory_space<semaphore_mem>>
    tpu.wait_dma2 semaphore(%153 : memref<!tpu.dma_semaphore, #tpu.memory_space<semaphore_mem>>) src(%150 : memref<1x32xf32, #tpu.memory_space<any>>) dst(%151 : memref<1x32xf32, #tpu.memory_space<vmem>>)
    %c1_i32_156 = arith.constant 1 : i32
    %c2_i32_157 = arith.constant 2 : i32
    %c0_i32_158 = arith.constant 0 : i32
    %154 = tpu.memref_slice %arg5[%34, %c0_i32_158] : memref<16x128xf32, #tpu.memory_space<any>> -> memref<1x128xf32, #tpu.memory_space<any>>
    %c2_i32_159 = arith.constant 2 : i32
    %c0_i32_160 = arith.constant 0 : i32
    %155 = tpu.memref_slice %arg9[%c2_i32_159, %c0_i32_160] : memref<8x128xf32, #tpu.memory_space<vmem>> -> memref<1x128xf32, #tpu.memory_space<vmem>>
    %156 = tpu.memref_slice %arg10[%c1_i32_156, %c2_i32_157] : memref<2x8x!tpu.dma_semaphore, #tpu.memory_space<semaphore_mem>> -> memref<1x1x!tpu.dma_semaphore, #tpu.memory_space<semaphore_mem>>
    %157 = tpu.memref_squeeze %156 : memref<1x1x!tpu.dma_semaphore, #tpu.memory_space<semaphore_mem>> -> memref<!tpu.dma_semaphore, #tpu.memory_space<semaphore_mem>>
    tpu.wait_dma2 semaphore(%157 : memref<!tpu.dma_semaphore, #tpu.memory_space<semaphore_mem>>) src(%154 : memref<1x128xf32, #tpu.memory_space<any>>) dst(%155 : memref<1x128xf32, #tpu.memory_space<vmem>>)
    %c0_i32_161 = arith.constant 0 : i32
    %c3_i32_162 = arith.constant 3 : i32
    %c0_i32_163 = arith.constant 0 : i32
    %158 = tpu.memref_slice %arg6[%39, %c0_i32_163] : memref<190662x32xf32, #tpu.memory_space<any>> -> memref<1x32xf32, #tpu.memory_space<any>>
    %c3_i32_164 = arith.constant 3 : i32
    %c0_i32_165 = arith.constant 0 : i32
    %159 = tpu.memref_slice %arg8[%c3_i32_164, %c0_i32_165] : memref<8x32xf32, #tpu.memory_space<vmem>> -> memref<1x32xf32, #tpu.memory_space<vmem>>
    %160 = tpu.memref_slice %arg10[%c0_i32_161, %c3_i32_162] : memref<2x8x!tpu.dma_semaphore, #tpu.memory_space<semaphore_mem>> -> memref<1x1x!tpu.dma_semaphore, #tpu.memory_space<semaphore_mem>>
    %161 = tpu.memref_squeeze %160 : memref<1x1x!tpu.dma_semaphore, #tpu.memory_space<semaphore_mem>> -> memref<!tpu.dma_semaphore, #tpu.memory_space<semaphore_mem>>
    tpu.wait_dma2 semaphore(%161 : memref<!tpu.dma_semaphore, #tpu.memory_space<semaphore_mem>>) src(%158 : memref<1x32xf32, #tpu.memory_space<any>>) dst(%159 : memref<1x32xf32, #tpu.memory_space<vmem>>)
    %c1_i32_166 = arith.constant 1 : i32
    %c3_i32_167 = arith.constant 3 : i32
    %c0_i32_168 = arith.constant 0 : i32
    %162 = tpu.memref_slice %arg5[%47, %c0_i32_168] : memref<16x128xf32, #tpu.memory_space<any>> -> memref<1x128xf32, #tpu.memory_space<any>>
    %c3_i32_169 = arith.constant 3 : i32
    %c0_i32_170 = arith.constant 0 : i32
    %163 = tpu.memref_slice %arg9[%c3_i32_169, %c0_i32_170] : memref<8x128xf32, #tpu.memory_space<vmem>> -> memref<1x128xf32, #tpu.memory_space<vmem>>
    %164 = tpu.memref_slice %arg10[%c1_i32_166, %c3_i32_167] : memref<2x8x!tpu.dma_semaphore, #tpu.memory_space<semaphore_mem>> -> memref<1x1x!tpu.dma_semaphore, #tpu.memory_space<semaphore_mem>>
    %165 = tpu.memref_squeeze %164 : memref<1x1x!tpu.dma_semaphore, #tpu.memory_space<semaphore_mem>> -> memref<!tpu.dma_semaphore, #tpu.memory_space<semaphore_mem>>
    tpu.wait_dma2 semaphore(%165 : memref<!tpu.dma_semaphore, #tpu.memory_space<semaphore_mem>>) src(%162 : memref<1x128xf32, #tpu.memory_space<any>>) dst(%163 : memref<1x128xf32, #tpu.memory_space<vmem>>)
    %c0_i32_171 = arith.constant 0 : i32
    %c4_i32_172 = arith.constant 4 : i32
    %c0_i32_173 = arith.constant 0 : i32
    %166 = tpu.memref_slice %arg6[%52, %c0_i32_173] : memref<190662x32xf32, #tpu.memory_space<any>> -> memref<1x32xf32, #tpu.memory_space<any>>
    %c4_i32_174 = arith.constant 4 : i32
    %c0_i32_175 = arith.constant 0 : i32
    %167 = tpu.memref_slice %arg8[%c4_i32_174, %c0_i32_175] : memref<8x32xf32, #tpu.memory_space<vmem>> -> memref<1x32xf32, #tpu.memory_space<vmem>>
    %168 = tpu.memref_slice %arg10[%c0_i32_171, %c4_i32_172] : memref<2x8x!tpu.dma_semaphore, #tpu.memory_space<semaphore_mem>> -> memref<1x1x!tpu.dma_semaphore, #tpu.memory_space<semaphore_mem>>
    %169 = tpu.memref_squeeze %168 : memref<1x1x!tpu.dma_semaphore, #tpu.memory_space<semaphore_mem>> -> memref<!tpu.dma_semaphore, #tpu.memory_space<semaphore_mem>>
    tpu.wait_dma2 semaphore(%169 : memref<!tpu.dma_semaphore, #tpu.memory_space<semaphore_mem>>) src(%166 : memref<1x32xf32, #tpu.memory_space<any>>) dst(%167 : memref<1x32xf32, #tpu.memory_space<vmem>>)
    %c1_i32_176 = arith.constant 1 : i32
    %c4_i32_177 = arith.constant 4 : i32
    %c0_i32_178 = arith.constant 0 : i32
    %170 = tpu.memref_slice %arg5[%60, %c0_i32_178] : memref<16x128xf32, #tpu.memory_space<any>> -> memref<1x128xf32, #tpu.memory_space<any>>
    %c4_i32_179 = arith.constant 4 : i32
    %c0_i32_180 = arith.constant 0 : i32
    %171 = tpu.memref_slice %arg9[%c4_i32_179, %c0_i32_180] : memref<8x128xf32, #tpu.memory_space<vmem>> -> memref<1x128xf32, #tpu.memory_space<vmem>>
    %172 = tpu.memref_slice %arg10[%c1_i32_176, %c4_i32_177] : memref<2x8x!tpu.dma_semaphore, #tpu.memory_space<semaphore_mem>> -> memref<1x1x!tpu.dma_semaphore, #tpu.memory_space<semaphore_mem>>
    %173 = tpu.memref_squeeze %172 : memref<1x1x!tpu.dma_semaphore, #tpu.memory_space<semaphore_mem>> -> memref<!tpu.dma_semaphore, #tpu.memory_space<semaphore_mem>>
    tpu.wait_dma2 semaphore(%173 : memref<!tpu.dma_semaphore, #tpu.memory_space<semaphore_mem>>) src(%170 : memref<1x128xf32, #tpu.memory_space<any>>) dst(%171 : memref<1x128xf32, #tpu.memory_space<vmem>>)
    %c0_i32_181 = arith.constant 0 : i32
    %c5_i32_182 = arith.constant 5 : i32
    %c0_i32_183 = arith.constant 0 : i32
    %174 = tpu.memref_slice %arg6[%65, %c0_i32_183] : memref<190662x32xf32, #tpu.memory_space<any>> -> memref<1x32xf32, #tpu.memory_space<any>>
    %c5_i32_184 = arith.constant 5 : i32
    %c0_i32_185 = arith.constant 0 : i32
    %175 = tpu.memref_slice %arg8[%c5_i32_184, %c0_i32_185] : memref<8x32xf32, #tpu.memory_space<vmem>> -> memref<1x32xf32, #tpu.memory_space<vmem>>
    %176 = tpu.memref_slice %arg10[%c0_i32_181, %c5_i32_182] : memref<2x8x!tpu.dma_semaphore, #tpu.memory_space<semaphore_mem>> -> memref<1x1x!tpu.dma_semaphore, #tpu.memory_space<semaphore_mem>>
    %177 = tpu.memref_squeeze %176 : memref<1x1x!tpu.dma_semaphore, #tpu.memory_space<semaphore_mem>> -> memref<!tpu.dma_semaphore, #tpu.memory_space<semaphore_mem>>
    tpu.wait_dma2 semaphore(%177 : memref<!tpu.dma_semaphore, #tpu.memory_space<semaphore_mem>>) src(%174 : memref<1x32xf32, #tpu.memory_space<any>>) dst(%175 : memref<1x32xf32, #tpu.memory_space<vmem>>)
    %c1_i32_186 = arith.constant 1 : i32
    %c5_i32_187 = arith.constant 5 : i32
    %c0_i32_188 = arith.constant 0 : i32
    %178 = tpu.memref_slice %arg5[%73, %c0_i32_188] : memref<16x128xf32, #tpu.memory_space<any>> -> memref<1x128xf32, #tpu.memory_space<any>>
    %c5_i32_189 = arith.constant 5 : i32
    %c0_i32_190 = arith.constant 0 : i32
    %179 = tpu.memref_slice %arg9[%c5_i32_189, %c0_i32_190] : memref<8x128xf32, #tpu.memory_space<vmem>> -> memref<1x128xf32, #tpu.memory_space<vmem>>
    %180 = tpu.memref_slice %arg10[%c1_i32_186, %c5_i32_187] : memref<2x8x!tpu.dma_semaphore, #tpu.memory_space<semaphore_mem>> -> memref<1x1x!tpu.dma_semaphore, #tpu.memory_space<semaphore_mem>>
    %181 = tpu.memref_squeeze %180 : memref<1x1x!tpu.dma_semaphore, #tpu.memory_space<semaphore_mem>> -> memref<!tpu.dma_semaphore, #tpu.memory_space<semaphore_mem>>
    tpu.wait_dma2 semaphore(%181 : memref<!tpu.dma_semaphore, #tpu.memory_space<semaphore_mem>>) src(%178 : memref<1x128xf32, #tpu.memory_space<any>>) dst(%179 : memref<1x128xf32, #tpu.memory_space<vmem>>)
    %c0_i32_191 = arith.constant 0 : i32
    %c6_i32_192 = arith.constant 6 : i32
    %c0_i32_193 = arith.constant 0 : i32
    %182 = tpu.memref_slice %arg6[%78, %c0_i32_193] : memref<190662x32xf32, #tpu.memory_space<any>> -> memref<1x32xf32, #tpu.memory_space<any>>
    %c6_i32_194 = arith.constant 6 : i32
    %c0_i32_195 = arith.constant 0 : i32
    %183 = tpu.memref_slice %arg8[%c6_i32_194, %c0_i32_195] : memref<8x32xf32, #tpu.memory_space<vmem>> -> memref<1x32xf32, #tpu.memory_space<vmem>>
    %184 = tpu.memref_slice %arg10[%c0_i32_191, %c6_i32_192] : memref<2x8x!tpu.dma_semaphore, #tpu.memory_space<semaphore_mem>> -> memref<1x1x!tpu.dma_semaphore, #tpu.memory_space<semaphore_mem>>
    %185 = tpu.memref_squeeze %184 : memref<1x1x!tpu.dma_semaphore, #tpu.memory_space<semaphore_mem>> -> memref<!tpu.dma_semaphore, #tpu.memory_space<semaphore_mem>>
    tpu.wait_dma2 semaphore(%185 : memref<!tpu.dma_semaphore, #tpu.memory_space<semaphore_mem>>) src(%182 : memref<1x32xf32, #tpu.memory_space<any>>) dst(%183 : memref<1x32xf32, #tpu.memory_space<vmem>>)
    %c1_i32_196 = arith.constant 1 : i32
    %c6_i32_197 = arith.constant 6 : i32
    %c0_i32_198 = arith.constant 0 : i32
    %186 = tpu.memref_slice %arg5[%86, %c0_i32_198] : memref<16x128xf32, #tpu.memory_space<any>> -> memref<1x128xf32, #tpu.memory_space<any>>
    %c6_i32_199 = arith.constant 6 : i32
    %c0_i32_200 = arith.constant 0 : i32
    %187 = tpu.memref_slice %arg9[%c6_i32_199, %c0_i32_200] : memref<8x128xf32, #tpu.memory_space<vmem>> -> memref<1x128xf32, #tpu.memory_space<vmem>>
    %188 = tpu.memref_slice %arg10[%c1_i32_196, %c6_i32_197] : memref<2x8x!tpu.dma_semaphore, #tpu.memory_space<semaphore_mem>> -> memref<1x1x!tpu.dma_semaphore, #tpu.memory_space<semaphore_mem>>
    %189 = tpu.memref_squeeze %188 : memref<1x1x!tpu.dma_semaphore, #tpu.memory_space<semaphore_mem>> -> memref<!tpu.dma_semaphore, #tpu.memory_space<semaphore_mem>>
    tpu.wait_dma2 semaphore(%189 : memref<!tpu.dma_semaphore, #tpu.memory_space<semaphore_mem>>) src(%186 : memref<1x128xf32, #tpu.memory_space<any>>) dst(%187 : memref<1x128xf32, #tpu.memory_space<vmem>>)
    %c0_i32_201 = arith.constant 0 : i32
    %c7_i32_202 = arith.constant 7 : i32
    %c0_i32_203 = arith.constant 0 : i32
    %190 = tpu.memref_slice %arg6[%91, %c0_i32_203] : memref<190662x32xf32, #tpu.memory_space<any>> -> memref<1x32xf32, #tpu.memory_space<any>>
    %c7_i32_204 = arith.constant 7 : i32
    %c0_i32_205 = arith.constant 0 : i32
    %191 = tpu.memref_slice %arg8[%c7_i32_204, %c0_i32_205] : memref<8x32xf32, #tpu.memory_space<vmem>> -> memref<1x32xf32, #tpu.memory_space<vmem>>
    %192 = tpu.memref_slice %arg10[%c0_i32_201, %c7_i32_202] : memref<2x8x!tpu.dma_semaphore, #tpu.memory_space<semaphore_mem>> -> memref<1x1x!tpu.dma_semaphore, #tpu.memory_space<semaphore_mem>>
    %193 = tpu.memref_squeeze %192 : memref<1x1x!tpu.dma_semaphore, #tpu.memory_space<semaphore_mem>> -> memref<!tpu.dma_semaphore, #tpu.memory_space<semaphore_mem>>
    tpu.wait_dma2 semaphore(%193 : memref<!tpu.dma_semaphore, #tpu.memory_space<semaphore_mem>>) src(%190 : memref<1x32xf32, #tpu.memory_space<any>>) dst(%191 : memref<1x32xf32, #tpu.memory_space<vmem>>)
    %c1_i32_206 = arith.constant 1 : i32
    %c7_i32_207 = arith.constant 7 : i32
    %c0_i32_208 = arith.constant 0 : i32
    %194 = tpu.memref_slice %arg5[%99, %c0_i32_208] : memref<16x128xf32, #tpu.memory_space<any>> -> memref<1x128xf32, #tpu.memory_space<any>>
    %c7_i32_209 = arith.constant 7 : i32
    %c0_i32_210 = arith.constant 0 : i32
    %195 = tpu.memref_slice %arg9[%c7_i32_209, %c0_i32_210] : memref<8x128xf32, #tpu.memory_space<vmem>> -> memref<1x128xf32, #tpu.memory_space<vmem>>
    %196 = tpu.memref_slice %arg10[%c1_i32_206, %c7_i32_207] : memref<2x8x!tpu.dma_semaphore, #tpu.memory_space<semaphore_mem>> -> memref<1x1x!tpu.dma_semaphore, #tpu.memory_space<semaphore_mem>>
    %197 = tpu.memref_squeeze %196 : memref<1x1x!tpu.dma_semaphore, #tpu.memory_space<semaphore_mem>> -> memref<!tpu.dma_semaphore, #tpu.memory_space<semaphore_mem>>
    tpu.wait_dma2 semaphore(%197 : memref<!tpu.dma_semaphore, #tpu.memory_space<semaphore_mem>>) src(%194 : memref<1x128xf32, #tpu.memory_space<any>>) dst(%195 : memref<1x128xf32, #tpu.memory_space<vmem>>)
    %c0_211 = arith.constant 0 : index
    %c0_212 = arith.constant 0 : index
    %198 = vector.load %arg8[%c0_211, %c0_212] : memref<8x32xf32, #tpu.memory_space<vmem>>, vector<8x32xf32>
    %c0_213 = arith.constant 0 : index
    %c0_214 = arith.constant 0 : index
    %199 = vector.load %arg4[%c0_213, %c0_214] : memref<64x128xf32, #tpu.memory_space<vmem>>, vector<32x128xf32>
    %cst_215 = arith.constant dense<0.000000e+00> : vector<8x128xf32>
    %200 = tpu.matmul %198, %199, %cst_215 {dimension_numbers = #tpu.dot_dimension_numbers<[1], [0], [0], [1], [0, 0, 1, 1], [], []>} : vector<8x32xf32>, vector<32x128xf32>, vector<8x128xf32> -> vector<8x128xf32>
    %201 = arith.addf %133, %200 : vector<8x128xf32>
    %c0_216 = arith.constant 0 : index
    %c0_217 = arith.constant 0 : index
    %202 = vector.load %arg9[%c0_216, %c0_217] : memref<8x128xf32, #tpu.memory_space<vmem>>, vector<8x128xf32>
    %203 = arith.addf %201, %202 : vector<8x128xf32>
    %c0_218 = arith.constant 0 : index
    %c0_219 = arith.constant 0 : index
    %204 = vector.load %arg7[%c0_218, %c0_219] : memref<8x128xf32, #tpu.memory_space<vmem>>, vector<8x128xf32>
    tpu.vector_store %arg7[%c0_218, %c0_219], %203 {strides = array<i32>} : memref<8x128xf32, #tpu.memory_space<vmem>>, vector<8x128xf32>,
    return
  }
  func.func @transform_0(%arg0: i32, %arg1: memref<8x3xi32, #tpu.memory_space<smem>>) -> (i32, i32) {
    %c0_i32 = arith.constant 0 : i32
    %c0_i32_0 = arith.constant 0 : i32
    %c0_i32_1 = arith.constant 0 : i32
    return %c0_i32, %c0_i32_0 : i32, i32
  }
  func.func @transform_1(%arg0: i32, %arg1: memref<8x3xi32, #tpu.memory_space<smem>>) -> (i32, i32) {
    %c0_i32 = arith.constant 0 : i32
    %c0_i32_0 = arith.constant 0 : i32
    %c0_i32_1 = arith.constant 0 : i32
    return %c0_i32, %c0_i32_0 : i32, i32
  }
  func.func @transform_2(%arg0: i32, %arg1: memref<8x3xi32, #tpu.memory_space<smem>>) -> (i32, i32) {
    %c0_i32 = arith.constant 0 : i32
    %c0_i32_0 = arith.constant 0 : i32
    %c0_i32_1 = arith.constant 0 : i32
    return %c0_i32, %c0_i32_0 : i32, i32
  }
  func.func @transform_5(%arg0: i32, %arg1: memref<8x3xi32, #tpu.memory_space<smem>>) -> (i32, i32) {
    %c0_i32 = arith.constant 0 : i32
    %c0_i32_0 = arith.constant 0 : i32
    %c0_i32_1 = arith.constant 0 : i32
    return %c0_i32, %c0_i32_0 : i32, i32
  }
}

</mosaic_0001>

<bundles_post_ra>
// kernel: _user_encoder_fwd.1
= control target key start
LH: loop header
LB: loop body
LE: loop exit
PB: predicated region body
PF: predicated region fallthrough
CT: control target
= control target key end

     0   :  { %s1635_s0 = inlined_call_operand.vmem [shape: s32[8,3], index: 0, kind: input, shape index: {}]   ;;  %s1636_s1 = inlined_call_operand.vmem [shape: f32[8,32], index: 1, kind: input, shape index: {}]   ;;  %s1637_s2 = inlined_call_operand.vmem [shape: f32[16,32], index: 2, kind: input, shape index: {}]   ;;  %s1638_s3 = inlined_call_operand.vmem [shape: f32[64,128], index: 3, kind: input, shape index: {}]   ;;  %s1639_s4 = inlined_call_operand.vmem [shape: f32[16,128], index: 4, kind: input, shape index: {}]   ;;  %s1640_s5 = inlined_call_operand.hbm [shape: f32[190662,32], index: 5, kind: input, shape index: {}]   ;;  %s1641_s6 = inlined_call_operand.hbm [shape: f32[8,128], index: 6, kind: output, shape index: {}]  }
   0x1   :  { %s11_s23 = sshll.u32 %s1635_s0, 4  ;;  %s12_s23 = int_to_ptr.vmem [resolvable:$true] %s11_s23 }
   0x2   :  { %s1154_s24 = scalar_lea.vmem %s12_s23, 128  ;;  %p1159_p1 = scmp.lt.s32.totalorder %s12_s23, %s12_s23 }
   0x3   :  { %p1155_p0 = scmp.ne.s32.totalorder %s12_s23, %s1154_s24  ;;  %p1160_p2 = scmp.lt.s32.totalorder %s1154_s24, %s1154_s24 }
   0x5   :  { %p1161_p3 = por %p1160_p2, %p1159_p1 }
   0x7   :  { %p1162_p4 = pnand %p1161_p3, %p1155_p0 }
   0x9   :  { %1165 = shalt.err (!%p1162_p4)  }
   0xa   :  { %s1416_s25 = smov [#allocation6]  }
   0xb   :  { %14 = dma.vmem_to_smem %s12_s23, 128, %s1416_s25, [#allocation5] }
   0xc   :  { %1380 = dma.done.wait [#allocation5], 128 }
   0xd   :  { %1381 = vsyncadd [#allocation5], 4294967168 }
   0xe   :  { %16 = sfence }
   0xf   :  { %17 = vsyncpa [#allocation8], 0  ;;  %s24_s26 = sld [smem:[#allocation6]]  ;;  %s1039_s27 = sld [smem:[#allocation6 + $0x1]] }
  0x10   :  { %s1417_s28 = smov [#allocation2]   ;;  %s1041_s30 = sld [smem:[#allocation6 + $0x2]] }
  0x11   :  { %s34_s29 = sshll.u32 %s1417_s28, 4  ;;  %s1475_s14 = scalar_lea.hbm %s1640_s5, 3050624  ;;  %s1467_s29 = int_to_ptr.vmem [resolvable:$true] %s34_s29 }
  0x15   :  { %s1038_s0 = sshll.u32 %s24_s26, 4  ;;  %s1040_s10 = sshll.u32 %s1039_s27, 1 }
  0x16   :  { %s26_s9 = scalar_lea.hbm %s1640_s5, %s1038_s0 }
  0x17   :  { %s1166_s11 = scalar_lea.hbm %s26_s9, 16  ;;  %p1169_p6 = scmp.lt.u32.totalorder %s26_s9, %s1640_s5 }
  0x18   :  { %p1167_p5 = scmp.ne.s32.totalorder %s26_s9, %s1166_s11  ;;  %p1170_p7 = scmp.lt.u32.totalorder %s1475_s14, %s1166_s11 }
  0x19   :  { %p1172_p9 = scmp.lt.u32.totalorder %s1166_s11, %s26_s9 }
  0x1a   :  { %p1171_p8 = por %p1170_p7, %p1169_p6 }
  0x1c   :  { %p1173_p10 = por %p1172_p9, %p1171_p8 }
  0x1e   :  { %p1174_p11 = pnand %p1173_p10, %p1167_p5 }
  0x20   :  { %1177 = shalt.err (!%p1174_p11)  }
  0x21   :  { %s1178_s17 = scalar_lea.vmem %s1467_s29, 16  ;;  %s1484_s18 = scalar_lea.vmem %s1467_s29, 128 }
  0x22   :  { %p1179_p12 = scmp.ne.s32.totalorder %s1467_s29, %s1178_s17  ;;  %p1183_p13 = scmp.lt.s32.totalorder %s1467_s29, %s1467_s29 }
  0x23   :  { %p1184_p0 = scmp.lt.s32.totalorder %s1484_s18, %s1178_s17 }
  0x25   :  { %p1185_p1 = por %p1184_p0, %p1183_p13 }
  0x27   :  { %p1186_p2 = pnand %p1185_p1, %p1179_p12 }
  0x29   :  { %1189 = shalt.err (!%p1186_p2)  }
  0x2a   :  { %37 = dma.hbm_to_vmem [thread:$0]  %s26_s9, 16, %s1467_s29, [#allocation4] }
  0x2b   :  { %s41_s19 = sadd.s32 %s1041_s30, %s1040_s10 }
  0x2c   :  { %s42_s22 = scalar_lea.vmem %s1639_s4, %s41_s19 }
  0x2d   :  { %v61_v0 = vld [vmem:[%s42_s22] sm:$0x1] }
  0x2e   :  { %62 = vst [vmem:[#allocation3] sm:$0x1] %v61_v0 }
  0x2f   :  { %87 = vsyncadd [#allocation4 + $0x8], 16  ;;  %s1042_s23 = sld [smem:[#allocation6 + $0x80]]  ;;  %s1044_s24 = sld [smem:[#allocation6 + $0x81]] }
  0x30   :  { %s1418_s25 = smov [#allocation2 + $0x1]   ;;  %s1046_s27 = sld [smem:[#allocation6 + $0x82]] }
  0x31   :  { %s100_s26 = sshll.u32 %s1418_s25, 4  ;;  %s101_s26 = int_to_ptr.vmem [resolvable:$true] %s100_s26 }
  0x35   :  { %s1043_s28 = sshll.u32 %s1042_s23, 4  ;;  %s1045_s30 = sshll.u32 %s1044_s24, 1 }
  0x36   :  { %s90_s8 = scalar_lea.hbm %s1640_s5, %s1043_s28 }
  0x37   :  { %s1190_s9 = scalar_lea.hbm %s90_s8, 16  ;;  %p1193_p4 = scmp.lt.u32.totalorder %s90_s8, %s1640_s5 }
  0x38   :  { %p1191_p3 = scmp.ne.s32.totalorder %s90_s8, %s1190_s9  ;;  %p1194_p5 = scmp.lt.u32.totalorder %s1475_s14, %s1190_s9 }
  0x39   :  { %p1196_p7 = scmp.lt.u32.totalorder %s1190_s9, %s90_s8 }
  0x3a   :  { %p1195_p6 = por %p1194_p5, %p1193_p4 }
  0x3c   :  { %p1197_p8 = por %p1196_p7, %p1195_p6 }
  0x3e   :  { %p1198_p9 = pnand %p1197_p8, %p1191_p3 }
  0x40   :  { %1201 = shalt.err (!%p1198_p9)  }
  0x41   :  { %s1202_s12 = scalar_lea.vmem %s101_s26, 16  ;;  %p1207_p11 = scmp.lt.s32.totalorder %s101_s26, %s1467_s29 }
  0x42   :  { %p1203_p10 = scmp.ne.s32.totalorder %s101_s26, %s1202_s12  ;;  %p1208_p12 = scmp.lt.s32.totalorder %s1484_s18, %s1202_s12 }
  0x44   :  { %p1209_p13 = por %p1208_p12, %p1207_p11 }
  0x46   :  { %p1210_p0 = pnand %p1209_p13, %p1203_p10 }
  0x48   :  { %1213 = shalt.err (!%p1210_p0)  }
  0x49   :  { %103 = dma.hbm_to_vmem [thread:$0]  %s90_s8, 16, %s101_s26, [#allocation4 + $0x1] }
  0x4a   :  { %s107_s13 = sadd.s32 %s1046_s27, %s1045_s30 }
  0x4b   :  { %s108_s17 = scalar_lea.vmem %s1639_s4, %s107_s13 }
  0x4c   :  { %v128_v1 = vld [vmem:[%s108_s17] sm:$0x1] }
  0x4d   :  { %129 = vst [vmem:[#allocation3 + $0x1] sm:$0x1] %v128_v1 }
  0x4e   :  { %154 = vsyncadd [#allocation4 + $0x9], 16  ;;  %s1047_s19 = sld [smem:[#allocation6 + $0x100]]  ;;  %s1049_s20 = sld [smem:[#allocation6 + $0x101]] }
  0x4f   :  { %s1419_s21 = smov [#allocation2 + $0x2]   ;;  %s1051_s23 = sld [smem:[#allocation6 + $0x102]] }
  0x50   :  { %s167_s22 = sshll.u32 %s1419_s21, 4  ;;  %s168_s22 = int_to_ptr.vmem [resolvable:$true] %s167_s22 }
  0x54   :  { %s1048_s24 = sshll.u32 %s1047_s19, 4  ;;  %s1050_s27 = sshll.u32 %s1049_s20, 1 }
  0x55   :  { %s157_s26 = scalar_lea.hbm %s1640_s5, %s1048_s24 }
  0x56   :  { %s1214_s0 = scalar_lea.hbm %s157_s26, 16  ;;  %p1217_p2 = scmp.lt.u32.totalorder %s157_s26, %s1640_s5 }
  0x57   :  { %p1215_p1 = scmp.ne.s32.totalorder %s157_s26, %s1214_s0  ;;  %p1218_p3 = scmp.lt.u32.totalorder %s1475_s14, %s1214_s0 }
  0x58   :  { %p1220_p5 = scmp.lt.u32.totalorder %s1214_s0, %s157_s26 }
  0x59   :  { %p1219_p4 = por %p1218_p3, %p1217_p2 }
  0x5b   :  { %p1221_p6 = por %p1220_p5, %p1219_p4 }
  0x5d   :  { %p1222_p7 = pnand %p1221_p6, %p1215_p1 }
  0x5f   :  { %1225 = shalt.err (!%p1222_p7)  }
  0x60   :  { %s1226_s30 = scalar_lea.vmem %s168_s22, 16  ;;  %p1231_p9 = scmp.lt.s32.totalorder %s168_s22, %s1467_s29 }
  0x61   :  { %p1227_p8 = scmp.ne.s32.totalorder %s168_s22, %s1226_s30  ;;  %p1232_p10 = scmp.lt.s32.totalorder %s1484_s18, %s1226_s30 }
  0x63   :  { %p1233_p11 = por %p1232_p10, %p1231_p9 }
  0x65   :  { %p1234_p12 = pnand %p1233_p11, %p1227_p8 }
  0x67   :  { %1237 = shalt.err (!%p1234_p12)  }
  0x68   :  { %170 = dma.hbm_to_vmem [thread:$0]  %s157_s26, 16, %s168_s22, [#allocation4 + $0x2] }
  0x69   :  { %s174_s9 = sadd.s32 %s1051_s23, %s1050_s27 }
  0x6a   :  { %s175_s12 = scalar_lea.vmem %s1639_s4, %s174_s9 }
  0x6b   :  { %v195_v2 = vld [vmem:[%s175_s12] sm:$0x1] }
  0x6c   :  { %196 = vst [vmem:[#allocation3 + $0x2] sm:$0x1] %v195_v2 }
  0x6d   :  { %221 = vsyncadd [#allocation4 + $0xa], 16  ;;  %s1052_s13 = sld [smem:[#allocation6 + $0x180]]  ;;  %s1054_s15 = sld [smem:[#allocation6 + $0x181]] }
  0x6e   :  { %s1420_s16 = smov [#allocation2 + $0x3]   ;;  %s1056_s19 = sld [smem:[#allocation6 + $0x182]] }
  0x6f   :  { %s234_s17 = sshll.u32 %s1420_s16, 4  ;;  %s235_s17 = int_to_ptr.vmem [resolvable:$true] %s234_s17 }
  0x73   :  { %s1053_s20 = sshll.u32 %s1052_s13, 4  ;;  %s1055_s23 = sshll.u32 %s1054_s15, 1 }
  0x74   :  { %s224_s22 = scalar_lea.hbm %s1640_s5, %s1053_s20 }
  0x75   :  { %s1238_s25 = scalar_lea.hbm %s224_s22, 16  ;;  %p1241_p0 = scmp.lt.u32.totalorder %s224_s22, %s1640_s5 }
  0x76   :  { %p1239_p13 = scmp.ne.s32.totalorder %s224_s22, %s1238_s25  ;;  %p1242_p1 = scmp.lt.u32.totalorder %s1475_s14, %s1238_s25 }
  0x77   :  { %p1244_p3 = scmp.lt.u32.totalorder %s1238_s25, %s224_s22 }
  0x78   :  { %p1243_p2 = por %p1242_p1, %p1241_p0 }
  0x7a   :  { %p1245_p4 = por %p1244_p3, %p1243_p2 }
  0x7c   :  { %p1246_p5 = pnand %p1245_p4, %p1239_p13 }
  0x7e   :  { %1249 = shalt.err (!%p1246_p5)  }
  0x7f   :  { %s1250_s27 = scalar_lea.vmem %s235_s17, 16  ;;  %p1255_p7 = scmp.lt.s32.totalorder %s235_s17, %s1467_s29 }
  0x80   :  { %p1251_p6 = scmp.ne.s32.totalorder %s235_s17, %s1250_s27  ;;  %p1256_p8 = scmp.lt.s32.totalorder %s1484_s18, %s1250_s27 }
  0x82   :  { %p1257_p9 = por %p1256_p8, %p1255_p7 }
  0x84   :  { %p1258_p10 = pnand %p1257_p9, %p1251_p6 }
  0x86   :  { %1261 = shalt.err (!%p1258_p10)  }
  0x87   :  { %237 = dma.hbm_to_vmem [thread:$0]  %s224_s22, 16, %s235_s17, [#allocation4 + $0x3] }
  0x88   :  { %s241_s0 = sadd.s32 %s1056_s19, %s1055_s23 }
  0x89   :  { %s242_s30 = scalar_lea.vmem %s1639_s4, %s241_s0 }
  0x8a   :  { %v262_v3 = vld [vmem:[%s242_s30] sm:$0x1] }
  0x8b   :  { %263 = vst [vmem:[#allocation3 + $0x3] sm:$0x1] %v262_v3 }
  0x8c   :  { %288 = vsyncadd [#allocation4 + $0xb], 16  ;;  %s1057_s9 = sld [smem:[#allocation6 + $0x200]]  ;;  %s1059_s10 = sld [smem:[#allocation6 + $0x201]] }
  0x8d   :  { %s1421_s11 = smov [#allocation2 + $0x4]   ;;  %s1061_s13 = sld [smem:[#allocation6 + $0x202]] }
  0x8e   :  { %s301_s12 = sshll.u32 %s1421_s11, 4  ;;  %s302_s12 = int_to_ptr.vmem [resolvable:$true] %s301_s12 }
  0x92   :  { %s1058_s15 = sshll.u32 %s1057_s9, 4  ;;  %s1060_s19 = sshll.u32 %s1059_s10, 1 }
  0x93   :  { %s291_s17 = scalar_lea.hbm %s1640_s5, %s1058_s15 }
  0x94   :  { %s1262_s21 = scalar_lea.hbm %s291_s17, 16  ;;  %p1265_p12 = scmp.lt.u32.totalorder %s291_s17, %s1640_s5 }
  0x95   :  { %p1263_p11 = scmp.ne.s32.totalorder %s291_s17, %s1262_s21  ;;  %p1266_p13 = scmp.lt.u32.totalorder %s1475_s14, %s1262_s21 }
  0x96   :  { %p1268_p1 = scmp.lt.u32.totalorder %s1262_s21, %s291_s17 }
  0x97   :  { %p1267_p0 = por %p1266_p13, %p1265_p12 }
  0x99   :  { %p1269_p2 = por %p1268_p1, %p1267_p0 }
  0x9b   :  { %p1270_p3 = pnand %p1269_p2, %p1263_p11 }
  0x9d   :  { %1273 = shalt.err (!%p1270_p3)  }
  0x9e   :  { %s1274_s23 = scalar_lea.vmem %s302_s12, 16  ;;  %p1279_p5 = scmp.lt.s32.totalorder %s302_s12, %s1467_s29 }
  0x9f   :  { %p1275_p4 = scmp.ne.s32.totalorder %s302_s12, %s1274_s23  ;;  %p1280_p6 = scmp.lt.s32.totalorder %s1484_s18, %s1274_s23 }
  0xa1   :  { %p1281_p7 = por %p1280_p6, %p1279_p5 }
  0xa3   :  { %p1282_p8 = pnand %p1281_p7, %p1275_p4 }
  0xa5   :  { %1285 = shalt.err (!%p1282_p8)  }
  0xa6   :  { %304 = dma.hbm_to_vmem [thread:$0]  %s291_s17, 16, %s302_s12, [#allocation4 + $0x4] }
  0xa7   :  { %s308_s25 = sadd.s32 %s1061_s13, %s1060_s19 }
  0xa8   :  { %s309_s27 = scalar_lea.vmem %s1639_s4, %s308_s25 }
  0xa9   :  { %v329_v4 = vld [vmem:[%s309_s27] sm:$0x1] }
  0xaa   :  { %330 = vst [vmem:[#allocation3 + $0x4] sm:$0x1] %v329_v4 }
  0xab   :  { %355 = vsyncadd [#allocation4 + $0xc], 16  ;;  %s1062_s0 = sld [smem:[#allocation6 + $0x280]]  ;;  %s1064_s7 = sld [smem:[#allocation6 + $0x281]] }
  0xac   :  { %s1422_s8 = smov [#allocation2 + $0x5]   ;;  %s1066_s9 = sld [smem:[#allocation6 + $0x282]] }
  0xad   :  { %s368_s30 = sshll.u32 %s1422_s8, 4  ;;  %s369_s30 = int_to_ptr.vmem [resolvable:$true] %s368_s30 }
  0xb1   :  { %s1063_s10 = sshll.u32 %s1062_s0, 4  ;;  %s1065_s13 = sshll.u32 %s1064_s7, 1 }
  0xb2   :  { %s358_s12 = scalar_lea.hbm %s1640_s5, %s1063_s10 }
  0xb3   :  { %s1286_s16 = scalar_lea.hbm %s358_s12, 16  ;;  %p1289_p10 = scmp.lt.u32.totalorder %s358_s12, %s1640_s5 }
  0xb4   :  { %p1287_p9 = scmp.ne.s32.totalorder %s358_s12, %s1286_s16  ;;  %p1290_p11 = scmp.lt.u32.totalorder %s1475_s14, %s1286_s16 }
  0xb5   :  { %p1292_p13 = scmp.lt.u32.totalorder %s1286_s16, %s358_s12 }
  0xb6   :  { %p1291_p12 = por %p1290_p11, %p1289_p10 }
  0xb8   :  { %p1293_p0 = por %p1292_p13, %p1291_p12 }
  0xba   :  { %p1294_p1 = pnand %p1293_p0, %p1287_p9 }
  0xbc   :  { %1297 = shalt.err (!%p1294_p1)  }
  0xbd   :  { %s1298_s19 = scalar_lea.vmem %s369_s30, 16  ;;  %p1303_p3 = scmp.lt.s32.totalorder %s369_s30, %s1467_s29 }
  0xbe   :  { %p1299_p2 = scmp.ne.s32.totalorder %s369_s30, %s1298_s19  ;;  %p1304_p4 = scmp.lt.s32.totalorder %s1484_s18, %s1298_s19 }
  0xc0   :  { %p1305_p5 = por %p1304_p4, %p1303_p3 }
  0xc2   :  { %p1306_p6 = pnand %p1305_p5, %p1299_p2 }
  0xc4   :  { %1309 = shalt.err (!%p1306_p6)  }
  0xc5   :  { %371 = dma.hbm_to_vmem [thread:$0]  %s358_s12, 16, %s369_s30, [#allocation4 + $0x5] }
  0xc6   :  { %s375_s21 = sadd.s32 %s1066_s9, %s1065_s13 }
  0xc7   :  { %s376_s23 = scalar_lea.vmem %s1639_s4, %s375_s21 }
  0xc8   :  { %v396_v5 = vld [vmem:[%s376_s23] sm:$0x1] }
  0xc9   :  { %397 = vst [vmem:[#allocation3 + $0x5] sm:$0x1] %v396_v5 }
  0xca   :  { %422 = vsyncadd [#allocation4 + $0xd], 16  ;;  %s1067_s25 = sld [smem:[#allocation6 + $0x300]]  ;;  %s1069_s28 = sld [smem:[#allocation6 + $0x301]] }
  0xcb   :  { %s1423_s26 = smov [#allocation2 + $0x6]   ;;  %s1071_s0 = sld [smem:[#allocation6 + $0x302]] }
  0xcc   :  { %s435_s27 = sshll.u32 %s1423_s26, 4  ;;  %s436_s27 = int_to_ptr.vmem [resolvable:$true] %s435_s27 }
  0xd0   :  { %s1068_s7 = sshll.u32 %s1067_s25, 4  ;;  %s1070_s9 = sshll.u32 %s1069_s28, 1 }
  0xd1   :  { %s425_s30 = scalar_lea.hbm %s1640_s5, %s1068_s7 }
  0xd2   :  { %s1310_s11 = scalar_lea.hbm %s425_s30, 16  ;;  %p1313_p8 = scmp.lt.u32.totalorder %s425_s30, %s1640_s5 }
  0xd3   :  { %p1311_p7 = scmp.ne.s32.totalorder %s425_s30, %s1310_s11  ;;  %p1314_p9 = scmp.lt.u32.totalorder %s1475_s14, %s1310_s11 }
  0xd4   :  { %p1316_p11 = scmp.lt.u32.totalorder %s1310_s11, %s425_s30 }
  0xd5   :  { %p1315_p10 = por %p1314_p9, %p1313_p8 }
  0xd7   :  { %p1317_p12 = por %p1316_p11, %p1315_p10 }
  0xd9   :  { %p1318_p13 = pnand %p1317_p12, %p1311_p7 }
  0xdb   :  { %1321 = shalt.err (!%p1318_p13)  }
  0xdc   :  { %s1322_s13 = scalar_lea.vmem %s436_s27, 16  ;;  %p1327_p1 = scmp.lt.s32.totalorder %s436_s27, %s1467_s29 }
  0xdd   :  { %p1323_p0 = scmp.ne.s32.totalorder %s436_s27, %s1322_s13  ;;  %p1328_p2 = scmp.lt.s32.totalorder %s1484_s18, %s1322_s13 }
  0xdf   :  { %p1329_p3 = por %p1328_p2, %p1327_p1 }
  0xe1   :  { %p1330_p4 = pnand %p1329_p3, %p1323_p0 }
  0xe3   :  { %1333 = shalt.err (!%p1330_p4)  }
  0xe4   :  { %438 = dma.hbm_to_vmem [thread:$0]  %s425_s30, 16, %s436_s27, [#allocation4 + $0x6] }
  0xe5   :  { %s442_s16 = sadd.s32 %s1071_s0, %s1070_s9 }
  0xe6   :  { %s443_s19 = scalar_lea.vmem %s1639_s4, %s442_s16 }
  0xe7   :  { %v463_v6 = vld [vmem:[%s443_s19] sm:$0x1] }
  0xe8   :  { %464 = vst [vmem:[#allocation3 + $0x6] sm:$0x1] %v463_v6 }
  0xe9   :  { %489 = vsyncadd [#allocation4 + $0xe], 16  ;;  %s1072_s21 = sld [smem:[#allocation6 + $0x380]]  ;;  %s1074_s24 = sld [smem:[#allocation6 + $0x381]] }
  0xea   :  { %s1424_s22 = smov [#allocation2 + $0x7]   ;;  %s1076_s25 = sld [smem:[#allocation6 + $0x382]] }
  0xeb   :  { %s502_s23 = sshll.u32 %s1424_s22, 4  ;;  %s503_s23 = int_to_ptr.vmem [resolvable:$true] %s502_s23 }
  0xef   :  { %s1073_s28 = sshll.u32 %s1072_s21, 4  ;;  %s1075_s0 = sshll.u32 %s1074_s24, 1 }
  0xf0   :  { %s492_s27 = scalar_lea.hbm %s1640_s5, %s1073_s28 }
  0xf1   :  { %s1334_s8 = scalar_lea.hbm %s492_s27, 16  ;;  %p1337_p6 = scmp.lt.u32.totalorder %s492_s27, %s1640_s5 }
  0xf2   :  { %p1335_p5 = scmp.ne.s32.totalorder %s492_s27, %s1334_s8  ;;  %p1338_p7 = scmp.lt.u32.totalorder %s1475_s14, %s1334_s8 }
  0xf3   :  { %p1340_p9 = scmp.lt.u32.totalorder %s1334_s8, %s492_s27 }
  0xf4   :  { %p1339_p8 = por %p1338_p7, %p1337_p6 }
  0xf6   :  { %p1341_p10 = por %p1340_p9, %p1339_p8 }
  0xf8   :  { %p1342_p11 = pnand %p1341_p10, %p1335_p5 }
  0xfa   :  { %1345 = shalt.err (!%p1342_p11)  }
  0xfb   :  { %s1346_s9 = scalar_lea.vmem %s503_s23, 16  ;;  %p1351_p13 = scmp.lt.s32.totalorder %s503_s23, %s1467_s29 }
  0xfc   :  { %p1347_p12 = scmp.ne.s32.totalorder %s503_s23, %s1346_s9  ;;  %p1352_p0 = scmp.lt.s32.totalorder %s1484_s18, %s1346_s9 }
  0xfe   :  { %p1353_p1 = por %p1352_p0, %p1351_p13 }
 0x100   :  { %p1354_p2 = pnand %p1353_p1, %p1347_p12 }
 0x102   :  { %1357 = shalt.err (!%p1354_p2)  }
 0x103   :  { %505 = dma.hbm_to_vmem [thread:$0]  %s492_s27, 16, %s503_s23, [#allocation4 + $0x7] }
 0x104   :  { %s509_s11 = sadd.s32 %s1076_s25, %s1075_s0 }
 0x105   :  { %s510_s5 = scalar_lea.vmem %s1639_s4, %s509_s11 }
 0x106   :  { %v530_v7 = vld [vmem:[%s510_s5] sm:$0x1] }
 0x107   :  { %531 = vst [vmem:[#allocation3 + $0x7] sm:$0x1] %v530_v7 }
 0x108   :  { %556 = vsyncadd [#allocation4 + $0xf], 16  ;;  %v557_v8 = vld [vmem:[%s1636_s1] sm:$0xff]  ;;  %vm558_vm0 = vcmask 261120   ;;  %v1589_v12 = vld [vmem:[%s1638_s3 + $0x28] sm:$0xff]  ;;  %v585_v33 = vlaneseq }
 0x109   :  { %v559_v9 = vsel %vm558_vm0, %v557_v8, 0.0  ;;  %v568_v10 = vmul.f32 %v557_v8, %v557_v8  ;;  %v1584_v11 = vld [vmem:[%s1638_s3 + $0x20] sm:$0xff]  ;;  %v1594_v13 = vld [vmem:[%s1638_s3 + $0x30] sm:$0xff]  ;;  %v1599_v15 = vld [vmem:[%s1638_s3 + $0x38] sm:$0xff] }
 0x10a   :  { %v560_v14 = vrot.slane %v559_v9, 4  ;;  %v586_v35 = vshrl.u32 %v585_v33, 7  ;;  %v580_v37 = vld [vmem:[%s1637_s2] sm:$0xff] }
 0x10b   :  { %v569_v16 = vsel %vm558_vm0, %v568_v10, 0.0 }
 0x10c   :  { %v561_v17 = vadd.f32 %v560_v14, %v559_v9  ;;  %v570_v18 = vrot.slane %v569_v16, 4  ;;  %v587_v36 = vsub.s32 0, %v586_v35  ;;  %v592_v39 = vsub.s32 1, %v586_v35 }
 0x10e   :  { %v562_v19 = vrot.slane %v561_v17, 2  ;;  %v571_v20 = vadd.f32 %v570_v18, %v569_v16  ;;  %v588_v40 = vrot.slane %v580_v37, %v587_v36  ;;  %v593_v43 = vrot.slane %v580_v37, %v592_v39 }
 0x110   :  { %v563_v21 = vadd.f32 %v562_v19, %v561_v17  ;;  %v572_v22 = vrot.slane %v571_v20, 2 }
 0x112   :  { %v564_v23 = vrot.slane %v563_v21, 1  ;;  %v573_v24 = vadd.f32 %v572_v22, %v571_v20 }
 0x114   :  { %v565_v25 = vadd.f32 %v564_v23, %v563_v21  ;;  %v574_v26 = vrot.slane %v573_v24, 1 }
 0x116   :  { %v567_v27 = vmul.f32 0.125, %v565_v25  ;;  %v575_v28 = vadd.f32 %v574_v26, %v573_v24 }
 0x118   :  { %v576_v29 = vmul.f32 0.125, %v575_v28  ;;  %v577_v30 = vmul.f32 %v567_v27, %v567_v27  ;;  %v581_v38 = vsub.f32 %v557_v8, %v567_v27 }
 0x11a   :  { %v578_v31 = vsub.f32 %v576_v29, %v577_v30 }
 0x11c   :  { %v579_v32 = vmax.f32 %v578_v31, 0.0 }
 0x11e   :  { %v582_v34 = vadd.f32 1e-05, %v579_v32 }
 0x120   :  { %1152 = vrsqrt.f32 %v582_v34 }
 0x12a   :  { %v1153_v41 = vpop.eup %1152 }
 0x12b   :  { %v584_v42 = vmul.f32 %v1153_v41, %v581_v38 }
 0x12d   :  { %v589_v44 = vmul.f32 %v588_v40, %v584_v42 }
 0x12f   :  { %v594_v45 = vadd.f32 %v593_v43, %v589_v44 }
 0x130   :  { %1382 = dma.done.wait [#allocation4], 16 }
 0x131   :  { %1383 = vsyncadd [#allocation4], 4294967280 }
 0x132   :  { %1384 = dma.done.wait [#allocation4 + $0x8], 16 }
 0x133   :  { %1385 = vsyncadd [#allocation4 + $0x8], 4294967280 }
 0x134   :  { %1386 = dma.done.wait [#allocation4 + $0x1], 16 }
 0x135   :  { %1387 = vsyncadd [#allocation4 + $0x1], 4294967280 }
 0x136   :  { %1388 = dma.done.wait [#allocation4 + $0x9], 16 }
 0x137   :  { %1389 = vsyncadd [#allocation4 + $0x9], 4294967280 }
 0x138   :  { %1390 = dma.done.wait [#allocation4 + $0x2], 16 }
 0x139   :  { %1391 = vsyncadd [#allocation4 + $0x2], 4294967280 }
 0x13a   :  { %1392 = dma.done.wait [#allocation4 + $0xa], 16 }
 0x13b   :  { %1393 = vsyncadd [#allocation4 + $0xa], 4294967280 }
 0x13c   :  { %1394 = dma.done.wait [#allocation4 + $0x3], 16 }
 0x13d   :  { %1395 = vsyncadd [#allocation4 + $0x3], 4294967280 }
 0x13e   :  { %1396 = dma.done.wait [#allocation4 + $0xb], 16 }
 0x13f   :  { %1397 = vsyncadd [#allocation4 + $0xb], 4294967280 }
 0x140   :  { %1398 = dma.done.wait [#allocation4 + $0x4], 16 }
 0x141   :  { %1399 = vsyncadd [#allocation4 + $0x4], 4294967280 }
 0x142   :  { %1400 = dma.done.wait [#allocation4 + $0xc], 16 }
 0x143   :  { %1401 = vsyncadd [#allocation4 + $0xc], 4294967280 }
 0x144   :  { %1402 = dma.done.wait [#allocation4 + $0x5], 16 }
 0x145   :  { %1403 = vsyncadd [#allocation4 + $0x5], 4294967280 }
 0x146   :  { %1404 = dma.done.wait [#allocation4 + $0xd], 16 }
 0x147   :  { %1405 = vsyncadd [#allocation4 + $0xd], 4294967280 }
 0x148   :  { %1406 = dma.done.wait [#allocation4 + $0x6], 16 }
 0x149   :  { %1407 = vsyncadd [#allocation4 + $0x6], 4294967280 }
 0x14a   :  { %1408 = dma.done.wait [#allocation4 + $0xe], 16 }
 0x14b   :  { %1409 = vsyncadd [#allocation4 + $0xe], 4294967280 }
 0x14c   :  { %1410 = dma.done.wait [#allocation4 + $0x7], 16 }
 0x14d   :  { %1411 = vsyncadd [#allocation4 + $0x7], 4294967280 }
 0x14e   :  { %1412 = dma.done.wait [#allocation4 + $0xf], 16 }
 0x14f   :  { %1413 = vsyncadd [#allocation4 + $0xf], 4294967280  ;;  %v1134_v46 = vpack.c.bf16 %v1589_v12, %v1584_v11  ;;  %v1425_v47 = vmov 0.0|0.0   ;;  %v1137_v48 = vpack.c.bf16 %v1599_v15, %v1594_v13  ;;  %vm1426_vm1 = vmmov 0   ;;  %v633_v50 = vld [vmem:[%s1638_s3] sm:$0xff]  ;;  %v634_v51 = vld [vmem:[%s1638_s3 + $0x8] sm:$0xff] }
 0x150   :  { %1133 = vmatprep.subr.bf16.mxu1 %v1425_v47  ;;  %1127 = vmatprep.subr.bf16.mxu0 %v1425_v47  ;;  %v1427_v49 = vmov 0.0   ;;  %v635_v52 = vld [vmem:[%s1638_s3 + $0x10] sm:$0xff]  ;;  %v1128_v53 = vpack.c.bf16 %v634_v51, %v633_v50  ;;  %v636_v54 = vld [vmem:[%s1638_s3 + $0x18] sm:$0xff]  ;;  %v632_v56 = vld [vmem:[#allocation2] sm:$0xff]  ;;  %s1428_s0 = smov [#allocation7]  }
 0x151   :  { %1135 = vmatpush3.bf16.msra.mxu1 %v1134_v46  ;;  %1124 = vmatprep.mubr.msk.f32.mxu1 %vm1426_vm1, %v1427_v49  ;;  %v1131_v55 = vpack.c.bf16 %v636_v54, %v635_v52  ;;  %v783_v60 = vld [vmem:[#allocation3] sm:$0xff]  ;;  %s792_s8 = sshll.u32 %s1428_s0, 4  ;;  %s793_s8 = int_to_ptr.vmem [resolvable:$true] %s792_s8 }
 0x152   :  { %1136 = vmatprep.subr.bf16.mxu1 %v1425_v47  ;;  %1113 = vmatprep.mubr.msk.f32.mxu0 %vm1426_vm1, %v1427_v49  ;;  %s1358_s3 = scalar_lea.vmem %s793_s8, 128  ;;  %p1363_p4 = scmp.lt.s32.totalorder %s793_s8, %s793_s8 }
 0x153   :  { %1129 = vmatpush3.bf16.msra.mxu0 %v1128_v53  ;;  %p1359_p3 = scmp.ne.s32.totalorder %s793_s8, %s1358_s3  ;;  %p1364_p5 = scmp.lt.s32.totalorder %s1358_s3, %s1358_s3 }
 0x154   :  { %1130 = vmatprep.subr.bf16.mxu0 %v1425_v47 }
 0x155   :  { %1138 = vmatpush3.bf16.msra.mxu1 %v1137_v48  ;;  %p1365_p6 = por %p1364_p5, %p1363_p4 }
 0x157   :  { %1132 = vmatpush3.bf16.msra.mxu0 %v1131_v55  ;;  %p1366_p7 = pnand %p1365_p6, %p1359_p3 }
 0x158   :  { %1125 = vmatmul.mubr.msk.f32.vlgmr.msra.gmra.mrb[0].mxu1 %vm558_vm0, %v594_v45 }
 0x15a   :  { %1114 = vmatmul.mubr.msk.f32.vlgmr.msra.gmra.mrb[0].mxu0 %vm558_vm0, %v632_v56 }
 0x22b   :  { %v779_v57 = vpop.f32.mrb[0].mxu1 }
 0x22c   :  { %v1126_v58 = vpop.f32.mrb[1].mxu1 }
 0x22d   :  { %v706_v59 = vpop.f32.mrb[0].mxu0 }
 0x22e   :  { %v780_v61 = vadd.f32 %v779_v57, %v706_v59  ;;  %v1115_v62 = vpop.f32.mrb[1].mxu0 }
 0x230   :  { %v784_v63 = vadd.f32 %v783_v60, %v780_v61 }
 0x232   :  { %785 = vst [vmem:[#allocation7] sm:$0xff] %v784_v63 }
 0x233   :  { %1369 = shalt.err (!%p1366_p7)
}
 0x234   :  { %s1370_s9 = scalar_lea.hbm %s1641_s6, 128 }
 0x235   :  { %p1371_p8 = scmp.ne.s32.totalorder %s1641_s6, %s1370_s9  ;;  %p1374_p9 = scmp.lt.u32.totalorder %s1370_s9, %s1641_s6 }
 0x237   :  { %p1376_p10 = pnand %p1374_p9, %p1371_p8 }
 0x239   :  { %1379 = shalt.err (!%p1376_p10)
}
 0x23a   :  { %795 = dma.vmem_to_hbm [thread:$0]  %s793_s8, 128, %s1641_s6, [#allocation8]  }
 0x23b   :  { %1414 = dma.done.wait [#allocation8], 128  }
 0x23c   :  { %1415 = vsyncadd [#allocation8], 4294967168 }
 0x23d   :  { %799 = vsyncpa [#allocation8], 1 }
 0x23e   :  { %800 = vsyncmov [#allocation4] }
 0x241   :  { %s801_s29 = vpop.sfrf %800 }
 0x242   :  { %p1079_p11 = scmp.ne.s32.totalorder %s801_s29, 0 }
 0x244   :  { %805 = shalt.err (%p1079_p11)  }
 0x245   :  { %807 = vsyncmov [#allocation4 + $0x1] }
 0x248   :  { %s808_s18 = vpop.sfrf %807 }
 0x249   :  { %p1080_p12 = scmp.ne.s32.totalorder %s808_s18, 0 }
 0x24b   :  { %812 = shalt.err (%p1080_p12)  }
 0x24c   :  { %814 = vsyncmov [#allocation4 + $0x2] }
 0x24f   :  { %s815_s16 = vpop.sfrf %814 }
 0x250   :  { %p1081_p13 = scmp.ne.s32.totalorder %s815_s16, 0 }
 0x252   :  { %819 = shalt.err (%p1081_p13)  }
 0x253   :  { %821 = vsyncmov [#allocation4 + $0x3] }
 0x256   :  { %s822_s20 = vpop.sfrf %821 }
 0x257   :  { %p1082_p0 = scmp.ne.s32.totalorder %s822_s20, 0 }
 0x259   :  { %826 = shalt.err (%p1082_p0)  }
 0x25a   :  { %828 = vsyncmov [#allocation4 + $0x4] }
 0x25d   :  { %s829_s6 = vpop.sfrf %828 }
 0x25e   :  { %p1083_p1 = scmp.ne.s32.totalorder %s829_s6, 0 }
 0x260   :  { %833 = shalt.err (%p1083_p1)  }
 0x261   :  { %835 = vsyncmov [#allocation4 + $0x5] }
 0x264   :  { %s836_s4 = vpop.sfrf %835 }
 0x265   :  { %p1084_p2 = scmp.ne.s32.totalorder %s836_s4, 0 }
 0x267   :  { %840 = shalt.err (%p1084_p2)  }
 0x268   :  { %842 = vsyncmov [#allocation4 + $0x6] }
 0x26b   :  { %s843_s17 = vpop.sfrf %842 }
 0x26c   :  { %p1085_p3 = scmp.ne.s32.totalorder %s843_s17, 0 }
 0x26e   :  { %847 = shalt.err (%p1085_p3)  }
 0x26f   :  { %849 = vsyncmov [#allocation4 + $0x7] }
 0x272   :  { %s850_s1 = vpop.sfrf %849 }
 0x273   :  { %p1086_p4 = scmp.ne.s32.totalorder %s850_s1, 0 }
 0x275   :  { %854 = shalt.err (%p1086_p4)  }
 0x276   :  { %856 = vsyncmov [#allocation4 + $0x8] }
 0x279   :  { %s857_s19 = vpop.sfrf %856 }
 0x27a   :  { %p1087_p5 = scmp.ne.s32.totalorder %s857_s19, 0 }
 0x27c   :  { %861 = shalt.err (%p1087_p5)  }
 0x27d   :  { %863 = vsyncmov [#allocation4 + $0x9] }
 0x280   :  { %s864_s21 = vpop.sfrf %863 }
 0x281   :  { %p1088_p6 = scmp.ne.s32.totalorder %s864_s21, 0 }
 0x283   :  { %868 = shalt.err (%p1088_p6)  }
 0x284   :  { %870 = vsyncmov [#allocation4 + $0xa] }
 0x287   :  { %s871_s24 = vpop.sfrf %870 }
 0x288   :  { %p1089_p7 = scmp.ne.s32.totalorder %s871_s24, 0 }
 0x28a   :  { %875 = shalt.err (%p1089_p7)  }
 0x28b   :  { %877 = vsyncmov [#allocation4 + $0xb] }
 0x28e   :  { %s878_s2 = vpop.sfrf %877 }
 0x28f   :  { %p1090_p8 = scmp.ne.s32.totalorder %s878_s2, 0 }
 0x291   :  { %882 = shalt.err (%p1090_p8)  }
 0x292   :  { %884 = vsyncmov [#allocation4 + $0xc] }
 0x295   :  { %s885_s22 = vpop.sfrf %884 }
 0x296   :  { %p1091_p9 = scmp.ne.s32.totalorder %s885_s22, 0 }
 0x298   :  { %889 = shalt.err (%p1091_p9)  }
 0x299   :  { %891 = vsyncmov [#allocation4 + $0xd] }
 0x29c   :  { %s892_s23 = vpop.sfrf %891 }
 0x29d   :  { %p1092_p10 = scmp.ne.s32.totalorder %s892_s23, 0 }
 0x29f   :  { %896 = shalt.err (%p1092_p10)  }
 0x2a0   :  { %898 = vsyncmov [#allocation4 + $0xe] }
 0x2a3   :  { %s899_s25 = vpop.sfrf %898 }
 0x2a4   :  { %p1093_p11 = scmp.ne.s32.totalorder %s899_s25, 0 }
 0x2a6   :  { %903 = shalt.err (%p1093_p11)  }
 0x2a7   :  { %905 = vsyncmov [#allocation4 + $0xf] }
 0x2aa   :  { %s906_s28 = vpop.sfrf %905 }
 0x2ab   :  { %p1094_p12 = scmp.ne.s32.totalorder %s906_s28, 0 }
 0x2ad   :  { %910 = shalt.err (%p1094_p12)  }

</bundles_post_ra>
